<compile_context>
chip_gen: v7x
topology: tpu7x:2x2x1
jax: 0.10.0
libtpu: 0.0.40
codegen_flags: <defaults>
</compile_context>

<pallas_src>
import jax
import jax.numpy as jnp
from jax import lax
from jax.experimental import pallas as pl
from jax.experimental.pallas import tpu as pltpu


# ============================================================================
# pltpu.roll convention probe (once): +1 -> jnp.roll semantics (y[n] = x[n-s]),
# -1 -> opposite (y[n] = x[n+s]), None -> roll unavailable, use slice+concat.
# ============================================================================
_ROLL_SIGN_CACHE = []


def _roll_convention():
    if _ROLL_SIGN_CACHE:
        return _ROLL_SIGN_CACHE[0]
    sign = None
    try:
        def probe_kernel(x_ref, o_ref):
            o_ref[...] = pltpu.roll(x_ref[...], 1, 1)

        x = jnp.tile(jnp.arange(128, dtype=jnp.float32), (8, 1))
        y = jax.block_until_ready(
            pl.pallas_call(
                probe_kernel,
                out_shape=jax.ShapeDtypeStruct((8, 128), jnp.float32),
            )(x))
        y00, y01 = float(y[0, 0]), float(y[0, 1])
        if y01 == 0.0 and y00 == 127.0:     # y[n] = x[n-1]  (jnp.roll)
            sign = 1
        elif y01 == 2.0 and y00 == 1.0:     # y[n] = x[n+1]
            sign = -1
    except Exception:
        sign = None
    _ROLL_SIGN_CACHE.append(sign)
    return sign


# ============================================================================
# Host-side helpers (run once per call / once per parameter set)
# ============================================================================
def _build_tap_masks(B, Ho, Wo):
    """(9, B*Ho*Wo) bf16 {0,1} multipliers: tap t=kh*3+kw valid-inside-image mask."""
    row = jnp.arange(Ho)[:, None]
    col = jnp.arange(Wo)[None, :]
    masks = []
    for kh in range(3):
        for kw in range(3):
            dh, dw = kh - 1, kw - 1
            m = jnp.ones((Ho, Wo), bool)
            if dh == -1:
                m = m & (row >= 1)
            elif dh == 1:
                m = m & (row < Ho - 1)
            if dw == -1:
                m = m & (col >= 1)
            elif dw == 1:
                m = m & (col < Wo - 1)
            masks.append(m)
    m = jnp.stack(masks).reshape(9, Ho * Wo)
    m = jnp.tile(m, (1, B))                       # lane l -> mask[l % HW]
    return m.astype(jnp.bfloat16)


def _pick_lane_batch(n_images, hw, per_image_vmem_bytes, *,
                     target_lanes=2048, vmem_budget=40 << 20):
    """How many images to pack onto the lane axis per grid step."""
    b = max(1, min(n_images, max(1, target_lanes // hw)))
    while b > 1 and b * per_image_vmem_bytes > vmem_budget:
        b -= 1
    # Prefer >=2 grid steps (keeps both v7x TensorCores busy) once lanes are plentiful.
    while n_images < 2 * b and b > 1 and (b // 2) * hw >= target_lanes:
        b //= 2
    return b


# ============================================================================
# Fused TwoPathResUnit kernel
# ============================================================================
def _make_fused_kernel(*, Wo, C_in, C1dw, C2dw, C_out, Cp1, LB,
                       prebuilt_taps, pw_with_act, roll_sign):
    R2 = C_out + 2 * Cp1

    def _shift(x, r):
        """y[:, n] = x[:, (n + r) % LB]  (cross-image spill is masked later)."""
        k = r % LB
        if k == 0:
            return x
        if roll_sign is None:                         # fallback: lane slice+concat
            return jnp.concatenate([x[:, k:], x[:, :k]], axis=1)
        return pltpu.roll(x, (-roll_sign * r) % LB, 1)   # XLU rotation

    def _build_taps(src, masks, scr_ref, C):
        """im2col: write the 9 shifted+masked taps of src (C, LB) into scr_ref (9C, LB)."""
        for kh in range(3):
            for kw in range(3):
                t = kh * 3 + kw
                tap = _shift(src, (kh - 1) * Wo + (kw - 1))
                if t != 4:                            # center tap needs no border mask
                    tap = tap * masks[t:t + 1, :]
                scr_ref[t * C:(t + 1) * C, :] = tap

    def kernel(x_ref, masks_ref, w1dw_ref, w1pw_ref, w2dw_ref, w2pw_ref,
               b_ref, out_ref, *scratch):
        if prebuilt_taps:
            (p2_scr,) = scratch
        else:
            p1_scr, p2_scr = scratch

        masks = masks_ref[...]                        # (9, LB) bf16, host-precomputed
        b = b_ref[...]                                # packed biases (R, 1) f32
        o = 0
        b1dw = b[o:o + 3 * C1dw]; o += 3 * C1dw
        b1pw = b[o:o + R2];       o += R2
        b2dw = b[o:o + C2dw];     o += C2dw
        b2pw = b[o:o + C_out]

        # ---- stage 1: short_cut / p1_conv1 / p1_conv2 share one stacked matmul ----
        if prebuilt_taps:
            patches1 = x_ref[0]                       # (9*C_in, LB) bf16 (wrapper im2col)
        else:
            _build_taps(x_ref[0], masks, p1_scr, C_in)     # bf16 taps, no f32 round trip
            patches1 = p1_scr[...]
        dw1 = jnp.dot(w1dw_ref[...], patches1,
                      preferred_element_type=jnp.float32)  # bf16 MXU, f32 acc
        dw1 = jnp.maximum(dw1 + b1dw, 0.0).astype(jnp.bfloat16)   # BN scale folded into W
        pw1 = jnp.dot(w1pw_ref[...], dw1,
                      preferred_element_type=jnp.float32)  # block-diag 1x1 convs
        pw1 = pw1 + b1pw
        short = pw1[:C_out]                                        # f32
        p1 = jnp.maximum(pw1[C_out:C_out + Cp1] + pw1[C_out + Cp1:],
                         0.0).astype(jnp.bfloat16)                 # two-path add + ReLU

        # ---- stage 2: p2_conv + residual add + optional ReLU ----------------------
        _build_taps(p1, masks, p2_scr, Cp1)
        dw2 = jnp.dot(w2dw_ref[...], p2_scr[...],
                      preferred_element_type=jnp.float32)
        dw2 = jnp.maximum(dw2 + b2dw, 0.0).astype(jnp.bfloat16)
        pw2 = jnp.dot(w2pw_ref[...], dw2,
                      preferred_element_type=jnp.float32)
        out = pw2 + b2pw + short
        if pw_with_act:
            out = jnp.maximum(out, 0.0)
        out_ref[0] = out                                           # lane-dense f32 store

    return kernel


def two_path_res_unit(x_nchw, prep, *, stride=1, pw_with_act=False, lane_batch=None):
    """Fused TwoPathResUnit forward (is_dim_match=False branch).

    x_nchw: (N, C_in, H, W) float32.  Returns (N, C_out, Ho, Wo) float32.
    """
    N, C_in, H, W = x_nchw.shape
    assert C_in == prep["C_in"]
    assert stride >= 1
    Ho = (H + 2 - 3) // stride + 1
    Wo = (W + 2 - 3) // stride + 1
    HW = Ho * Wo
    C_out, Cp1 = prep["C_out"], prep["Cp1"]
    C1dw, C2dw = prep["C1dw"], prep["C2dw"]

    x_q = x_nchw.astype(jnp.bfloat16)                 # HBM activations in bf16
    if stride == 1:
        imgs = x_q.reshape(N, C_in, HW)               # channels-first, flat spatial
        prebuilt = False
    else:
        # TODO(synk): wrapper-side im2col for stride>1 reads ~9x the input bytes.
        xp = jnp.pad(x_q, ((0, 0), (0, 0), (1, 1), (1, 1)))
        taps = [xp[:, :, kh:kh + (Ho - 1) * stride + 1:stride,
                   kw:kw + (Wo - 1) * stride + 1:stride]
                for kh in range(3) for kw in range(3)]
        imgs = jnp.concatenate(taps, axis=1).reshape(N, 9 * C_in, HW)
        prebuilt = True
    C_lead = imgs.shape[1]

    # Per-image VMEM working set (input/output double-buffered blocks, patch
    # scratches, f32/bf16 intermediates) -> lane-batch choice + explicit limit.
    f32b, bf16b = 4, 2
    per_img = (2 * C_lead * HW * bf16b
               + 2 * C_out * HW * f32b
               + (0 if prebuilt else 9 * C_in * HW * bf16b)
               + 9 * Cp1 * HW * bf16b
               + (3 * C1dw + (C_out + 2 * Cp1) + C_out + Cp1 + C2dw + 2 * C_out)
               * HW * f32b)
    B = lane_batch or _pick_lane_batch(N, HW, per_img)
    G = -(-N // B)
    if G * B != N:
        pad = jnp.zeros((G * B - N, C_lead, HW), imgs.dtype)
        imgs = jnp.concatenate([imgs, pad], axis=0)
    # Pack B images onto the lane axis: (G, C_lead, B*HW).  B*HW is a multiple of
    # 128 whenever HW is (16x16 -> 256), keeping every store/load lane-dense.
    lead = imgs.reshape(G, B, C_lead, HW).transpose(0, 2, 1, 3).reshape(G, C_lead, B * HW)
    LB = B * HW

    masks = _build_tap_masks(B, Ho, Wo)
    roll_sign = _roll_convention()
    kernel = _make_fused_kernel(Wo=Wo, C_in=C_in, C1dw=C1dw, C2dw=C2dw,
                                C_out=C_out, Cp1=Cp1, LB=LB,
                                prebuilt_taps=prebuilt, pw_with_act=pw_with_act,
                                roll_sign=roll_sign)

    w1dw, w1pw, w2dw, w2pw, b_all = prep["weights"]
    consts = [masks, w1dw, w1pw, w2dw, w2pw, b_all]

    def _const_spec(a):
        nd = a.ndim
        return pl.BlockSpec(a.shape, lambda g: (0,) * nd)   # constant block: DMA'd once

    in_specs = [pl.BlockSpec((1, C_lead, LB), lambda g: (g, 0, 0))]
    in_specs += [_const_spec(a) for a in consts]

    scratch = []
    if not prebuilt:
        scratch.append(pltpu.VMEM((9 * C_in, LB), jnp.bfloat16))   # stage-1 im2col
    scratch.append(pltpu.VMEM((9 * Cp1, LB), jnp.bfloat16))        # stage-2 im2col

    vmem_limit = int(min(max(2 * B * per_img + (2 << 20), 16 << 20), 64 << 20))

    out_flat = pl.pallas_call(
        kernel,
        grid=(G,),
        in_specs=in_specs,
        out_specs=pl.BlockSpec((1, C_out, LB), lambda g: (g, 0, 0)),
        out_shape=jax.ShapeDtypeStruct((G, C_out, LB), jnp.float32),
        scratch_shapes=scratch,
        compiler_params=pltpu.CompilerParams(
            dimension_semantics=("parallel",),
            vmem_limit_bytes=vmem_limit),
    )(lead, *consts)

    out = out_flat.reshape(G, C_out, B, HW).transpose(0, 2, 1, 3)
    return out.reshape(G * B, C_out, Ho, Wo)[:N]


# ============================================================================
# One-time parameter preparation (BN scales folded into weights, hoisted)
# ============================================================================
def _expand_group_conv(w, groups):
    """(C_out, C_in//g, 3, 3) grouped weight -> dense block-diag (C_out, C_in, 3, 3)."""
    C_out, C_in_g, KH, KW = w.shape
    cgo = C_out // groups
    C_in = C_in_g * groups
    dense = jnp.zeros((C_out, C_in, KH, KW), w.dtype)
    for g in range(groups):
        dense = dense.at[g * cgo:(g + 1) * cgo,
                         g * C_in_g:(g + 1) * C_in_g].set(w[g * cgo:(g + 1) * cgo])
    return dense


def _dw_to_matmul(w_dense):
    """(C_out, C_in, 3, 3) -> (C_out, 9*C_in), tap-major (t = kh*3 + kw outer)."""
    C_out, C_in, KH, KW = w_dense.shape
    return jnp.transpose(w_dense, (0, 2, 3, 1)).reshape(C_out, KH * KW * C_in)


def prepare_params(raw, *, is_dim_match=False):
    """Fold BN scales into weights, expand groups to block-diagonal, cast to bf16."""
    if is_dim_match:
        # TODO(synk): is_dim_match=True branch (identity short_cut, single p1 conv
        # with pointwise ReLU) is not implemented in the fused kernel.
        raise NotImplementedError("is_dim_match=True branch not implemented")
    g1, g2 = raw["cfg"]["groups1"], raw["cfg"]["groups2"]
    sc, p1a, p1b, p2 = (raw["short_cut"], raw["p1_conv1"],
                        raw["p1_conv2"], raw["p2_conv"])

    C1dw = sc["w_dw"].shape[0]
    C_in = sc["w_dw"].shape[1] * g1
    C_out = sc["w_pw"].shape[0]
    Cp1 = p1a["w_pw"].shape[0]
    C2dw = p2["w_dw"].shape[0]

    def dw_mat(p, groups):
        # Fold BN scale in f32 BEFORE the bf16 cast so kernel and reference share
        # identical quantization points.
        w = p["w_dw"] * p["dw_scale"][:, None, None, None]
        return _dw_to_matmul(_expand_group_conv(w, groups))

    def pw_mat(p):
        c_o, c_i = p["w_pw"].shape[:2]
        return p["w_pw"].reshape(c_o, c_i) * p["pw_scale"][:, None]

    # Stage-1 grouped 3x3 convs, stacked rows: [short_cut | p1_conv1 | p1_conv2].
    w1dw = jnp.concatenate([dw_mat(sc, g1), dw_mat(p1a, g1), dw_mat(p1b, g1)], axis=0)
    b1dw = jnp.concatenate([sc["dw_bias"], p1a["dw_bias"], p1b["dw_bias"]])[:, None]

    # Stage-1 1x1 pointwise convs as one block-diagonal matmul.
    R2 = C_out + 2 * Cp1
    w1pw = jnp.zeros((R2, 3 * C1dw), jnp.float32)
    w1pw = w1pw.at[:C_out, :C1dw].set(pw_mat(sc))
    w1pw = w1pw.at[C_out:C_out + Cp1, C1dw:2 * C1dw].set(pw_mat(p1a))
    w1pw = w1pw.at[C_out + Cp1:, 2 * C1dw:].set(pw_mat(p1b))
    b1pw = jnp.concatenate([sc["pw_bias"], p1a["pw_bias"], p1b["pw_bias"]])[:, None]

    # Stage-2 (p2_conv).
    w2dw = dw_mat(p2, g2)
    b2dw = p2["dw_bias"][:, None]
    w2pw = pw_mat(p2)
    b2pw = p2["pw_bias"][:, None]

    b_all = jnp.concatenate([b1dw, b1pw, b2dw, b2pw], axis=0).astype(jnp.float32)
    bf16 = lambda a: a.astype(jnp.bfloat16)
    weights = [bf16(w1dw), bf16(w1pw), bf16(w2dw), bf16(w2pw), b_all]
    return dict(weights=weights, C_in=C_in, C_out=C_out, Cp1=Cp1,
                C1dw=C1dw, C2dw=C2dw)


# ============================================================================
# Deterministic parameter init (BN folded to scale/bias -- inference semantics)
# ============================================================================
def _init_bn(key, c, eps=1e-5):
    k1, k2, k3, k4 = jax.random.split(key, 4)
    gamma = jax.random.uniform(k1, (c,), minval=0.5, maxval=1.5)
    beta = jax.random.uniform(k2, (c,), minval=-0.2, maxval=0.2)
    mean = jax.random.uniform(k3, (c,), minval=-0.5, maxval=0.5)
    var = jax.random.uniform(k4, (c,), minval=0.5, maxval=1.5)
    scale = gamma / jnp.sqrt(var + eps)
    bias = beta - mean * scale
    return scale.astype(jnp.float32), bias.astype(jnp.float32)


def _init_sep(key, c_in, c_dw, c_out, groups):
    ks = jax.random.split(key, 4)
    w_dw = (jax.random.normal(ks[0], (c_dw, c_in // groups, 3, 3))
            / jnp.sqrt((c_in // groups) * 9.0)).astype(jnp.float32)
    dw_scale, dw_bias = _init_bn(ks[1], c_dw)
    w_pw = (jax.random.normal(ks[2], (c_out, c_dw, 1, 1))
            / jnp.sqrt(float(c_dw))).astype(jnp.float32)
    pw_scale, pw_bias = _init_bn(ks[3], c_out)
    return dict(w_dw=w_dw, dw_scale=dw_scale, dw_bias=dw_bias,
                w_pw=w_pw, pw_scale=pw_scale, pw_bias=pw_bias)


# ============================================================================
# Pure-JAX reference (lax.conv).  Mirrors the kernel's quantization points:
# BN scale folded into the f32 weight before the bf16 cast, activations cast
# to bf16 before every conv, f32 accumulation and f32 bias/add/ReLU.
# ============================================================================
def _q(a):
    return a.astype(jnp.bfloat16).astype(jnp.float32)


def _ref_sep(x, p, groups, stride):
    w_dw = _q(p["w_dw"] * p["dw_scale"][:, None, None, None])
    y = lax.conv_general_dilated(
        _q(x), w_dw, (stride, stride), ((1, 1), (1, 1)),
        feature_group_count=groups,
        dimension_numbers=("NCHW", "OIHW", "NCHW"),
        precision=lax.Precision.HIGHEST)
    y = jnp.maximum(y + p["dw_bias"][None, :, None, None], 0.0)
    w_pw = _q(p["w_pw"] * p["pw_scale"][:, None, None, None])
    y = lax.conv_general_dilated(
        _q(y), w_pw, (1, 1), "VALID",
        dimension_numbers=("NCHW", "OIHW", "NCHW"),
        precision=lax.Precision.HIGHEST)
    return y + p["pw_bias"][None, :, None, None]


def _ref_forward(x, raw, *, stride, pw_with_act):
    g1, g2 = raw["cfg"]["groups1"], raw["cfg"]["groups2"]
    short = _ref_sep(x, raw["short_cut"], g1, stride)
    p1 = jnp.maximum(_ref_sep(x, raw["p1_conv2"], g1, stride)
                     + _ref_sep(x, raw["p1_conv1"], g1, stride), 0.0)
    out = _ref_sep(p1, raw["p2_conv"], g2, 1) + short
    if pw_with_act:
        out = jnp.maximum(out, 0.0)
    return out


# ============================================================================
if __name__ == "__main__":
    # TwoPathResUnit hyper-parameters.  factor=1 keeps p2_conv's declared
    # in_channels (= pw_num_filter*factor) equal to p1_out's channel count, so
    # the fused kernel matches the module exactly as declared.
    dw_num_filter = 16
    group_base = 4
    pw_num_filter = 16
    pw_num_filter2 = 16
    factor = 1
    stride = 1
    is_dim_match = False        # exercise the full two-path + short_cut branch
    pw_with_act = True
    input_channel = int(dw_num_filter * factor)   # input_channel=None path

    assert dw_num_filter * factor % group_base == 0
    assert pw_num_filter * factor % group_base == 0
    groups1 = dw_num_filter // group_base          # stage-1 grouped convs
    groups2 = pw_num_filter // group_base          # p2_conv grouped conv
    c_dw1 = int(dw_num_filter * factor)
    c_dw2 = int(pw_num_filter * factor)

    key = jax.random.PRNGKey(0)
    k_x, k_sc, k_a, k_b, k_p2 = jax.random.split(key, 5)

    raw = {
        "cfg": {"groups1": groups1, "groups2": groups2},
        "short_cut": _init_sep(k_sc, input_channel, c_dw1, pw_num_filter2, groups1),
        "p1_conv1": _init_sep(k_a, input_channel, c_dw1, pw_num_filter, groups1),
        "p1_conv2": _init_sep(k_b, input_channel, c_dw1, pw_num_filter, groups1),
        "p2_conv": _init_sep(k_p2, int(pw_num_filter * factor), c_dw2,
                             pw_num_filter2, groups2),
    }
    # TODO(synk): BatchNorm is folded into scale/bias (eval mode); training-mode
    # batch statistics and the quantized FloatFunctional/QAT plumbing are not modeled.

    prep = prepare_params(raw, is_dim_match=is_dim_match)   # hoisted, runs once

    x = jax.random.normal(k_x, (2, input_channel, 16, 16), dtype=jnp.float32)

    out = two_path_res_unit(x, prep, stride=stride, pw_with_act=pw_with_act)
    out = jax.block_until_ready(out)

    ref = _ref_forward(x, raw, stride=stride, pw_with_act=pw_with_act)
    assert out.shape == ref.shape == (2, pw_num_filter2, 16, 16), out.shape
    max_err = float(jnp.max(jnp.abs(out - ref)))
    # bf16 MXU path with bf16 intermediates: independent summation orders can
    # round an intermediate to a neighbouring bf16 value (~0.4% of it), so allow
    # ~1e-2; structural bugs would show up as O(1) errors.
    assert jnp.allclose(out, ref, atol=1e-2, rtol=1e-2), max_err

    print("KERNEL_OK")
</pallas_src>

<mosaic_0001>
module attributes {stable_mosaic.version = 11 : i64} {
  func.func @probe_kernel(%arg0: memref<8x128xf32, #tpu.memory_space<vmem>>, %arg1: memref<8x128xf32, #tpu.memory_space<vmem>>) attributes {dimension_semantics = [], scalar_prefetch = 0 : i64, scratch_operands = 0 : i64, tpu.core_type = #tpu.core_type<tc>} {
    %c0 = arith.constant 0 : index
    %c0_0 = arith.constant 0 : index
    %0 = vector.load %arg0[%c0, %c0_0] : memref<8x128xf32, #tpu.memory_space<vmem>>, vector<8x128xf32>
    %c1_i32 = arith.constant 1 : i32
    %1 = tpu.dynamic_rotate %0 by %c1_i32 dim 1 : vector<8x128xf32>, i32 -> vector<8x128xf32>
    %c0_1 = arith.constant 0 : index
    %c0_2 = arith.constant 0 : index
    %2 = vector.load %arg1[%c0_1, %c0_2] : memref<8x128xf32, #tpu.memory_space<vmem>>, vector<8x128xf32>
    tpu.vector_store %arg1[%c0_1, %c0_2], %1 {strides = array<i32>} : memref<8x128xf32, #tpu.memory_space<vmem>>, vector<8x128xf32>,
    return
  }
}

module attributes {stable_mosaic.version = 11 : i64} {
  func.func @kernel(%arg0: i32, %arg1: memref<1x16x512xbf16, #tpu.memory_space<vmem>>, %arg2: memref<9x512xbf16, #tpu.memory_space<vmem>>, %arg3: memref<48x144xbf16, #tpu.memory_space<vmem>>, %arg4: memref<48x48xbf16, #tpu.memory_space<vmem>>, %arg5: memref<16x144xbf16, #tpu.memory_space<vmem>>, %arg6: memref<16x16xbf16, #tpu.memory_space<vmem>>, %arg7: memref<128x1xf32, #tpu.memory_space<vmem>>, %arg8: memref<1x16x512xf32, #tpu.memory_space<vmem>>, %arg9: memref<144x512xbf16, #tpu.memory_space<vmem>>, %arg10: memref<144x512xbf16, #tpu.memory_space<vmem>>) attributes {dimension_semantics = [#tpu.dimension_semantics<parallel>], iteration_bounds = array<i64: 1>, scalar_prefetch = 0 : i64, scratch_operands = 2 : i64, tpu.core_type = #tpu.core_type<tc>, window_params = [{transform_indices = @transform_0, window_bounds = array<i64: 1, 16, 512>}, {pipeline_mode = #tpu.pipeline_mode<synchronous>, transform_indices = @transform_1, window_bounds = array<i64: 9, 512>}, {pipeline_mode = #tpu.pipeline_mode<synchronous>, transform_indices = @transform_2, window_bounds = array<i64: 48, 144>}, {pipeline_mode = #tpu.pipeline_mode<synchronous>, transform_indices = @transform_3, window_bounds = array<i64: 48, 48>}, {pipeline_mode = #tpu.pipeline_mode<synchronous>, transform_indices = @transform_4, window_bounds = array<i64: 16, 144>}, {pipeline_mode = #tpu.pipeline_mode<synchronous>, transform_indices = @transform_5, window_bounds = array<i64: 16, 16>}, {pipeline_mode = #tpu.pipeline_mode<synchronous>, transform_indices = @transform_6, window_bounds = array<i64: 128, 1>}, {transform_indices = @transform_7, window_bounds = array<i64: 1, 16, 512>}]} {
    %c0 = arith.constant 0 : index
    %c0_0 = arith.constant 0 : index
    %0 = vector.load %arg2[%c0, %c0_0] : memref<9x512xbf16, #tpu.memory_space<vmem>>, vector<9x512xbf16>
    %c0_1 = arith.constant 0 : index
    %c0_2 = arith.constant 0 : index
    %1 = vector.load %arg7[%c0_1, %c0_2] : memref<128x1xf32, #tpu.memory_space<vmem>>, vector<128x1xf32>
    %2 = vector.extract_strided_slice %1 {offsets = [0, 0], sizes = [48, 1], strides = [1, 1]} : vector<128x1xf32> to vector<48x1xf32>
    %3 = vector.extract_strided_slice %1 {offsets = [48, 0], sizes = [48, 1], strides = [1, 1]} : vector<128x1xf32> to vector<48x1xf32>
    %4 = vector.extract_strided_slice %1 {offsets = [96, 0], sizes = [16, 1], strides = [1, 1]} : vector<128x1xf32> to vector<16x1xf32>
    %5 = vector.extract_strided_slice %1 {offsets = [112, 0], sizes = [16, 1], strides = [1, 1]} : vector<128x1xf32> to vector<16x1xf32>
    %c0_3 = arith.constant 0 : index
    %c0_4 = arith.constant 0 : index
    %c0_5 = arith.constant 0 : index
    %6 = vector.load %arg1[%c0_3, %c0_4, %c0_5] : memref<1x16x512xbf16, #tpu.memory_space<vmem>>, vector<1x16x512xbf16>
    %7 = vector.shape_cast %6 : vector<1x16x512xbf16> to vector<16x512xbf16>
    %8 = vector.extract_strided_slice %7 {offsets = [0, 495], sizes = [16, 17], strides = [1, 1]} : vector<16x512xbf16> to vector<16x17xbf16>
    %9 = vector.extract_strided_slice %7 {offsets = [0, 0], sizes = [16, 495], strides = [1, 1]} : vector<16x512xbf16> to vector<16x495xbf16>
    %10 = tpu.concatenate %8, %9 in 1 : vector<16x17xbf16>, vector<16x495xbf16> -> vector<16x512xbf16>
    %11 = vector.extract_strided_slice %0 {offsets = [0, 0], sizes = [1, 512], strides = [1, 1]} : vector<9x512xbf16> to vector<1x512xbf16>
    %12 = vector.broadcast %11 : vector<1x512xbf16> to vector<16x512xbf16>
    %13 = arith.mulf %10, %12 : vector<16x512xbf16>
    %c0_6 = arith.constant 0 : index
    %c0_7 = arith.constant 0 : index
    %14 = vector.load %arg9[%c0_6, %c0_7] : memref<144x512xbf16, #tpu.memory_space<vmem>>, vector<16x512xbf16>
    tpu.vector_store %arg9[%c0_6, %c0_7], %13 {strides = array<i32>} : memref<144x512xbf16, #tpu.memory_space<vmem>>, vector<16x512xbf16>,
    %15 = vector.extract_strided_slice %7 {offsets = [0, 496], sizes = [16, 16], strides = [1, 1]} : vector<16x512xbf16> to vector<16x16xbf16>
    %16 = vector.extract_strided_slice %7 {offsets = [0, 0], sizes = [16, 496], strides = [1, 1]} : vector<16x512xbf16> to vector<16x496xbf16>
    %17 = tpu.concatenate %15, %16 in 1 : vector<16x16xbf16>, vector<16x496xbf16> -> vector<16x512xbf16>
    %18 = vector.extract_strided_slice %0 {offsets = [1, 0], sizes = [1, 512], strides = [1, 1]} : vector<9x512xbf16> to vector<1x512xbf16>
    %19 = vector.broadcast %18 : vector<1x512xbf16> to vector<16x512xbf16>
    %20 = arith.mulf %17, %19 : vector<16x512xbf16>
    %c16 = arith.constant 16 : index
    %c0_8 = arith.constant 0 : index
    %21 = vector.load %arg9[%c16, %c0_8] : memref<144x512xbf16, #tpu.memory_space<vmem>>, vector<16x512xbf16>
    tpu.vector_store %arg9[%c16, %c0_8], %20 {strides = array<i32>} : memref<144x512xbf16, #tpu.memory_space<vmem>>, vector<16x512xbf16>,
    %22 = vector.extract_strided_slice %7 {offsets = [0, 497], sizes = [16, 15], strides = [1, 1]} : vector<16x512xbf16> to vector<16x15xbf16>
    %23 = vector.extract_strided_slice %7 {offsets = [0, 0], sizes = [16, 497], strides = [1, 1]} : vector<16x512xbf16> to vector<16x497xbf16>
    %24 = tpu.concatenate %22, %23 in 1 : vector<16x15xbf16>, vector<16x497xbf16> -> vector<16x512xbf16>
    %25 = vector.extract_strided_slice %0 {offsets = [2, 0], sizes = [1, 512], strides = [1, 1]} : vector<9x512xbf16> to vector<1x512xbf16>
    %26 = vector.broadcast %25 : vector<1x512xbf16> to vector<16x512xbf16>
    %27 = arith.mulf %24, %26 : vector<16x512xbf16>
    %c32 = arith.constant 32 : index
    %c0_9 = arith.constant 0 : index
    %28 = vector.load %arg9[%c32, %c0_9] : memref<144x512xbf16, #tpu.memory_space<vmem>>, vector<16x512xbf16>
    tpu.vector_store %arg9[%c32, %c0_9], %27 {strides = array<i32>} : memref<144x512xbf16, #tpu.memory_space<vmem>>, vector<16x512xbf16>,
    %29 = vector.extract_strided_slice %7 {offsets = [0, 511], sizes = [16, 1], strides = [1, 1]} : vector<16x512xbf16> to vector<16x1xbf16>
    %30 = vector.extract_strided_slice %7 {offsets = [0, 0], sizes = [16, 511], strides = [1, 1]} : vector<16x512xbf16> to vector<16x511xbf16>
    %31 = tpu.concatenate %29, %30 in 1 : vector<16x1xbf16>, vector<16x511xbf16> -> vector<16x512xbf16>
    %32 = vector.extract_strided_slice %0 {offsets = [3, 0], sizes = [1, 512], strides = [1, 1]} : vector<9x512xbf16> to vector<1x512xbf16>
    %33 = vector.broadcast %32 : vector<1x512xbf16> to vector<16x512xbf16>
    %34 = arith.mulf %31, %33 : vector<16x512xbf16>
    %c48 = arith.constant 48 : index
    %c0_10 = arith.constant 0 : index
    %35 = vector.load %arg9[%c48, %c0_10] : memref<144x512xbf16, #tpu.memory_space<vmem>>, vector<16x512xbf16>
    tpu.vector_store %arg9[%c48, %c0_10], %34 {strides = array<i32>} : memref<144x512xbf16, #tpu.memory_space<vmem>>, vector<16x512xbf16>,
    %c64 = arith.constant 64 : index
    %c0_11 = arith.constant 0 : index
    %36 = vector.load %arg9[%c64, %c0_11] : memref<144x512xbf16, #tpu.memory_space<vmem>>, vector<16x512xbf16>
    tpu.vector_store %arg9[%c64, %c0_11], %7 {strides = array<i32>} : memref<144x512xbf16, #tpu.memory_space<vmem>>, vector<16x512xbf16>,
    %37 = vector.extract_strided_slice %7 {offsets = [0, 1], sizes = [16, 511], strides = [1, 1]} : vector<16x512xbf16> to vector<16x511xbf16>
    %38 = vector.extract_strided_slice %7 {offsets = [0, 0], sizes = [16, 1], strides = [1, 1]} : vector<16x512xbf16> to vector<16x1xbf16>
    %39 = tpu.concatenate %37, %38 in 1 : vector<16x511xbf16>, vector<16x1xbf16> -> vector<16x512xbf16>
    %40 = vector.extract_strided_slice %0 {offsets = [5, 0], sizes = [1, 512], strides = [1, 1]} : vector<9x512xbf16> to vector<1x512xbf16>
    %41 = vector.broadcast %40 : vector<1x512xbf16> to vector<16x512xbf16>
    %42 = arith.mulf %39, %41 : vector<16x512xbf16>
    %c80 = arith.constant 80 : index
    %c0_12 = arith.constant 0 : index
    %43 = vector.load %arg9[%c80, %c0_12] : memref<144x512xbf16, #tpu.memory_space<vmem>>, vector<16x512xbf16>
    tpu.vector_store %arg9[%c80, %c0_12], %42 {strides = array<i32>} : memref<144x512xbf16, #tpu.memory_space<vmem>>, vector<16x512xbf16>,
    %44 = vector.extract_strided_slice %7 {offsets = [0, 15], sizes = [16, 497], strides = [1, 1]} : vector<16x512xbf16> to vector<16x497xbf16>
    %45 = vector.extract_strided_slice %7 {offsets = [0, 0], sizes = [16, 15], strides = [1, 1]} : vector<16x512xbf16> to vector<16x15xbf16>
    %46 = tpu.concatenate %44, %45 in 1 : vector<16x497xbf16>, vector<16x15xbf16> -> vector<16x512xbf16>
    %47 = vector.extract_strided_slice %0 {offsets = [6, 0], sizes = [1, 512], strides = [1, 1]} : vector<9x512xbf16> to vector<1x512xbf16>
    %48 = vector.broadcast %47 : vector<1x512xbf16> to vector<16x512xbf16>
    %49 = arith.mulf %46, %48 : vector<16x512xbf16>
    %c96 = arith.constant 96 : index
    %c0_13 = arith.constant 0 : index
    %50 = vector.load %arg9[%c96, %c0_13] : memref<144x512xbf16, #tpu.memory_space<vmem>>, vector<16x512xbf16>
    tpu.vector_store %arg9[%c96, %c0_13], %49 {strides = array<i32>} : memref<144x512xbf16, #tpu.memory_space<vmem>>, vector<16x512xbf16>,
    %51 = vector.extract_strided_slice %7 {offsets = [0, 16], sizes = [16, 496], strides = [1, 1]} : vector<16x512xbf16> to vector<16x496xbf16>
    %52 = vector.extract_strided_slice %7 {offsets = [0, 0], sizes = [16, 16], strides = [1, 1]} : vector<16x512xbf16> to vector<16x16xbf16>
    %53 = tpu.concatenate %51, %52 in 1 : vector<16x496xbf16>, vector<16x16xbf16> -> vector<16x512xbf16>
    %54 = vector.extract_strided_slice %0 {offsets = [7, 0], sizes = [1, 512], strides = [1, 1]} : vector<9x512xbf16> to vector<1x512xbf16>
    %55 = vector.broadcast %54 : vector<1x512xbf16> to vector<16x512xbf16>
    %56 = arith.mulf %53, %55 : vector<16x512xbf16>
    %c112 = arith.constant 112 : index
    %c0_14 = arith.constant 0 : index
    %57 = vector.load %arg9[%c112, %c0_14] : memref<144x512xbf16, #tpu.memory_space<vmem>>, vector<16x512xbf16>
    tpu.vector_store %arg9[%c112, %c0_14], %56 {strides = array<i32>} : memref<144x512xbf16, #tpu.memory_space<vmem>>, vector<16x512xbf16>,
    %58 = vector.extract_strided_slice %7 {offsets = [0, 17], sizes = [16, 495], strides = [1, 1]} : vector<16x512xbf16> to vector<16x495xbf16>
    %59 = vector.extract_strided_slice %7 {offsets = [0, 0], sizes = [16, 17], strides = [1, 1]} : vector<16x512xbf16> to vector<16x17xbf16>
    %60 = tpu.concatenate %58, %59 in 1 : vector<16x495xbf16>, vector<16x17xbf16> -> vector<16x512xbf16>
    %61 = vector.extract_strided_slice %0 {offsets = [8, 0], sizes = [1, 512], strides = [1, 1]} : vector<9x512xbf16> to vector<1x512xbf16>
    %62 = vector.broadcast %61 : vector<1x512xbf16> to vector<16x512xbf16>
    %63 = arith.mulf %60, %62 : vector<16x512xbf16>
    %c128 = arith.constant 128 : index
    %c0_15 = arith.constant 0 : index
    %64 = vector.load %arg9[%c128, %c0_15] : memref<144x512xbf16, #tpu.memory_space<vmem>>, vector<16x512xbf16>
    tpu.vector_store %arg9[%c128, %c0_15], %63 {strides = array<i32>} : memref<144x512xbf16, #tpu.memory_space<vmem>>, vector<16x512xbf16>,
    %c0_16 = arith.constant 0 : index
    %c0_17 = arith.constant 0 : index
    %65 = vector.load %arg9[%c0_16, %c0_17] : memref<144x512xbf16, #tpu.memory_space<vmem>>, vector<144x512xbf16>
    %c0_18 = arith.constant 0 : index
    %c0_19 = arith.constant 0 : index
    %66 = vector.load %arg3[%c0_18, %c0_19] : memref<48x144xbf16, #tpu.memory_space<vmem>>, vector<48x144xbf16>
    %cst = arith.constant dense<0.000000e+00> : vector<48x512xf32>
    %67 = tpu.matmul %66, %65, %cst {dimension_numbers = #tpu.dot_dimension_numbers<[1], [0], [0], [1], [0, 0, 1, 1], [], []>} : vector<48x144xbf16>, vector<144x512xbf16>, vector<48x512xf32> -> vector<48x512xf32>
    %68 = vector.broadcast %2 : vector<48x1xf32> to vector<48x512xf32>
    %69 = arith.addf %67, %68 : vector<48x512xf32>
    %cst_20 = arith.constant 0.000000e+00 : f32
    %70 = vector.broadcast %cst_20 : f32 to vector<48x512xf32>
    %71 = arith.maximumf %69, %70 : vector<48x512xf32>
    %72 = arith.truncf %71 : vector<48x512xf32> to vector<48x512xbf16>
    %c0_21 = arith.constant 0 : index
    %c0_22 = arith.constant 0 : index
    %73 = vector.load %arg4[%c0_21, %c0_22] : memref<48x48xbf16, #tpu.memory_space<vmem>>, vector<48x48xbf16>
    %cst_23 = arith.constant dense<0.000000e+00> : vector<48x512xf32>
    %74 = tpu.matmul %73, %72, %cst_23 {dimension_numbers = #tpu.dot_dimension_numbers<[1], [0], [0], [1], [0, 0, 1, 1], [], []>} : vector<48x48xbf16>, vector<48x512xbf16>, vector<48x512xf32> -> vector<48x512xf32>
    %75 = vector.broadcast %3 : vector<48x1xf32> to vector<48x512xf32>
    %76 = arith.addf %74, %75 : vector<48x512xf32>
    %77 = vector.extract_strided_slice %76 {offsets = [0, 0], sizes = [16, 512], strides = [1, 1]} : vector<48x512xf32> to vector<16x512xf32>
    %78 = vector.extract_strided_slice %76 {offsets = [16, 0], sizes = [16, 512], strides = [1, 1]} : vector<48x512xf32> to vector<16x512xf32>
    %79 = vector.extract_strided_slice %76 {offsets = [32, 0], sizes = [16, 512], strides = [1, 1]} : vector<48x512xf32> to vector<16x512xf32>
    %80 = arith.addf %78, %79 : vector<16x512xf32>
    %cst_24 = arith.constant 0.000000e+00 : f32
    %81 = vector.broadcast %cst_24 : f32 to vector<16x512xf32>
    %82 = arith.maximumf %80, %81 : vector<16x512xf32>
    %83 = arith.truncf %82 : vector<16x512xf32> to vector<16x512xbf16>
    %84 = vector.extract_strided_slice %83 {offsets = [0, 495], sizes = [16, 17], strides = [1, 1]} : vector<16x512xbf16> to vector<16x17xbf16>
    %85 = vector.extract_strided_slice %83 {offsets = [0, 0], sizes = [16, 495], strides = [1, 1]} : vector<16x512xbf16> to vector<16x495xbf16>
    %86 = tpu.concatenate %84, %85 in 1 : vector<16x17xbf16>, vector<16x495xbf16> -> vector<16x512xbf16>
    %87 = vector.extract_strided_slice %0 {offsets = [0, 0], sizes = [1, 512], strides = [1, 1]} : vector<9x512xbf16> to vector<1x512xbf16>
    %88 = vector.broadcast %87 : vector<1x512xbf16> to vector<16x512xbf16>
    %89 = arith.mulf %86, %88 : vector<16x512xbf16>
    %c0_25 = arith.constant 0 : index
    %c0_26 = arith.constant 0 : index
    %90 = vector.load %arg10[%c0_25, %c0_26] : memref<144x512xbf16, #tpu.memory_space<vmem>>, vector<16x512xbf16>
    tpu.vector_store %arg10[%c0_25, %c0_26], %89 {strides = array<i32>} : memref<144x512xbf16, #tpu.memory_space<vmem>>, vector<16x512xbf16>,
    %91 = vector.extract_strided_slice %83 {offsets = [0, 496], sizes = [16, 16], strides = [1, 1]} : vector<16x512xbf16> to vector<16x16xbf16>
    %92 = vector.extract_strided_slice %83 {offsets = [0, 0], sizes = [16, 496], strides = [1, 1]} : vector<16x512xbf16> to vector<16x496xbf16>
    %93 = tpu.concatenate %91, %92 in 1 : vector<16x16xbf16>, vector<16x496xbf16> -> vector<16x512xbf16>
    %94 = vector.extract_strided_slice %0 {offsets = [1, 0], sizes = [1, 512], strides = [1, 1]} : vector<9x512xbf16> to vector<1x512xbf16>
    %95 = vector.broadcast %94 : vector<1x512xbf16> to vector<16x512xbf16>
    %96 = arith.mulf %93, %95 : vector<16x512xbf16>
    %c16_27 = arith.constant 16 : index
    %c0_28 = arith.constant 0 : index
    %97 = vector.load %arg10[%c16_27, %c0_28] : memref<144x512xbf16, #tpu.memory_space<vmem>>, vector<16x512xbf16>
    tpu.vector_store %arg10[%c16_27, %c0_28], %96 {strides = array<i32>} : memref<144x512xbf16, #tpu.memory_space<vmem>>, vector<16x512xbf16>,
    %98 = vector.extract_strided_slice %83 {offsets = [0, 497], sizes = [16, 15], strides = [1, 1]} : vector<16x512xbf16> to vector<16x15xbf16>
    %99 = vector.extract_strided_slice %83 {offsets = [0, 0], sizes = [16, 497], strides = [1, 1]} : vector<16x512xbf16> to vector<16x497xbf16>
    %100 = tpu.concatenate %98, %99 in 1 : vector<16x15xbf16>, vector<16x497xbf16> -> vector<16x512xbf16>
    %101 = vector.extract_strided_slice %0 {offsets = [2, 0], sizes = [1, 512], strides = [1, 1]} : vector<9x512xbf16> to vector<1x512xbf16>
    %102 = vector.broadcast %101 : vector<1x512xbf16> to vector<16x512xbf16>
    %103 = arith.mulf %100, %102 : vector<16x512xbf16>
    %c32_29 = arith.constant 32 : index
    %c0_30 = arith.constant 0 : index
    %104 = vector.load %arg10[%c32_29, %c0_30] : memref<144x512xbf16, #tpu.memory_space<vmem>>, vector<16x512xbf16>
    tpu.vector_store %arg10[%c32_29, %c0_30], %103 {strides = array<i32>} : memref<144x512xbf16, #tpu.memory_space<vmem>>, vector<16x512xbf16>,
    %105 = vector.extract_strided_slice %83 {offsets = [0, 511], sizes = [16, 1], strides = [1, 1]} : vector<16x512xbf16> to vector<16x1xbf16>
    %106 = vector.extract_strided_slice %83 {offsets = [0, 0], sizes = [16, 511], strides = [1, 1]} : vector<16x512xbf16> to vector<16x511xbf16>
    %107 = tpu.concatenate %105, %106 in 1 : vector<16x1xbf16>, vector<16x511xbf16> -> vector<16x512xbf16>
    %108 = vector.extract_strided_slice %0 {offsets = [3, 0], sizes = [1, 512], strides = [1, 1]} : vector<9x512xbf16> to vector<1x512xbf16>
    %109 = vector.broadcast %108 : vector<1x512xbf16> to vector<16x512xbf16>
    %110 = arith.mulf %107, %109 : vector<16x512xbf16>
    %c48_31 = arith.constant 48 : index
    %c0_32 = arith.constant 0 : index
    %111 = vector.load %arg10[%c48_31, %c0_32] : memref<144x512xbf16, #tpu.memory_space<vmem>>, vector<16x512xbf16>
    tpu.vector_store %arg10[%c48_31, %c0_32], %110 {strides = array<i32>} : memref<144x512xbf16, #tpu.memory_space<vmem>>, vector<16x512xbf16>,
    %c64_33 = arith.constant 64 : index
    %c0_34 = arith.constant 0 : index
    %112 = vector.load %arg10[%c64_33, %c0_34] : memref<144x512xbf16, #tpu.memory_space<vmem>>, vector<16x512xbf16>
    tpu.vector_store %arg10[%c64_33, %c0_34], %83 {strides = array<i32>} : memref<144x512xbf16, #tpu.memory_space<vmem>>, vector<16x512xbf16>,
    %113 = vector.extract_strided_slice %83 {offsets = [0, 1], sizes = [16, 511], strides = [1, 1]} : vector<16x512xbf16> to vector<16x511xbf16>
    %114 = vector.extract_strided_slice %83 {offsets = [0, 0], sizes = [16, 1], strides = [1, 1]} : vector<16x512xbf16> to vector<16x1xbf16>
    %115 = tpu.concatenate %113, %114 in 1 : vector<16x511xbf16>, vector<16x1xbf16> -> vector<16x512xbf16>
    %116 = vector.extract_strided_slice %0 {offsets = [5, 0], sizes = [1, 512], strides = [1, 1]} : vector<9x512xbf16> to vector<1x512xbf16>
    %117 = vector.broadcast %116 : vector<1x512xbf16> to vector<16x512xbf16>
    %118 = arith.mulf %115, %117 : vector<16x512xbf16>
    %c80_35 = arith.constant 80 : index
    %c0_36 = arith.constant 0 : index
    %119 = vector.load %arg10[%c80_35, %c0_36] : memref<144x512xbf16, #tpu.memory_space<vmem>>, vector<16x512xbf16>
    tpu.vector_store %arg10[%c80_35, %c0_36], %118 {strides = array<i32>} : memref<144x512xbf16, #tpu.memory_space<vmem>>, vector<16x512xbf16>,
    %120 = vector.extract_strided_slice %83 {offsets = [0, 15], sizes = [16, 497], strides = [1, 1]} : vector<16x512xbf16> to vector<16x497xbf16>
    %121 = vector.extract_strided_slice %83 {offsets = [0, 0], sizes = [16, 15], strides = [1, 1]} : vector<16x512xbf16> to vector<16x15xbf16>
    %122 = tpu.concatenate %120, %121 in 1 : vector<16x497xbf16>, vector<16x15xbf16> -> vector<16x512xbf16>
    %123 = vector.extract_strided_slice %0 {offsets = [6, 0], sizes = [1, 512], strides = [1, 1]} : vector<9x512xbf16> to vector<1x512xbf16>
    %124 = vector.broadcast %123 : vector<1x512xbf16> to vector<16x512xbf16>
    %125 = arith.mulf %122, %124 : vector<16x512xbf16>
    %c96_37 = arith.constant 96 : index
    %c0_38 = arith.constant 0 : index
    %126 = vector.load %arg10[%c96_37, %c0_38] : memref<144x512xbf16, #tpu.memory_space<vmem>>, vector<16x512xbf16>
    tpu.vector_store %arg10[%c96_37, %c0_38], %125 {strides = array<i32>} : memref<144x512xbf16, #tpu.memory_space<vmem>>, vector<16x512xbf16>,
    %127 = vector.extract_strided_slice %83 {offsets = [0, 16], sizes = [16, 496], strides = [1, 1]} : vector<16x512xbf16> to vector<16x496xbf16>
    %128 = vector.extract_strided_slice %83 {offsets = [0, 0], sizes = [16, 16], strides = [1, 1]} : vector<16x512xbf16> to vector<16x16xbf16>
    %129 = tpu.concatenate %127, %128 in 1 : vector<16x496xbf16>, vector<16x16xbf16> -> vector<16x512xbf16>
    %130 = vector.extract_strided_slice %0 {offsets = [7, 0], sizes = [1, 512], strides = [1, 1]} : vector<9x512xbf16> to vector<1x512xbf16>
    %131 = vector.broadcast %130 : vector<1x512xbf16> to vector<16x512xbf16>
    %132 = arith.mulf %129, %131 : vector<16x512xbf16>
    %c112_39 = arith.constant 112 : index
    %c0_40 = arith.constant 0 : index
    %133 = vector.load %arg10[%c112_39, %c0_40] : memref<144x512xbf16, #tpu.memory_space<vmem>>, vector<16x512xbf16>
    tpu.vector_store %arg10[%c112_39, %c0_40], %132 {strides = array<i32>} : memref<144x512xbf16, #tpu.memory_space<vmem>>, vector<16x512xbf16>,
    %134 = vector.extract_strided_slice %83 {offsets = [0, 17], sizes = [16, 495], strides = [1, 1]} : vector<16x512xbf16> to vector<16x495xbf16>
    %135 = vector.extract_strided_slice %83 {offsets = [0, 0], sizes = [16, 17], strides = [1, 1]} : vector<16x512xbf16> to vector<16x17xbf16>
    %136 = tpu.concatenate %134, %135 in 1 : vector<16x495xbf16>, vector<16x17xbf16> -> vector<16x512xbf16>
    %137 = vector.extract_strided_slice %0 {offsets = [8, 0], sizes = [1, 512], strides = [1, 1]} : vector<9x512xbf16> to vector<1x512xbf16>
    %138 = vector.broadcast %137 : vector<1x512xbf16> to vector<16x512xbf16>
    %139 = arith.mulf %136, %138 : vector<16x512xbf16>
    %c128_41 = arith.constant 128 : index
    %c0_42 = arith.constant 0 : index
    %140 = vector.load %arg10[%c128_41, %c0_42] : memref<144x512xbf16, #tpu.memory_space<vmem>>, vector<16x512xbf16>
    tpu.vector_store %arg10[%c128_41, %c0_42], %139 {strides = array<i32>} : memref<144x512xbf16, #tpu.memory_space<vmem>>, vector<16x512xbf16>,
    %c0_43 = arith.constant 0 : index
    %c0_44 = arith.constant 0 : index
    %141 = vector.load %arg5[%c0_43, %c0_44] : memref<16x144xbf16, #tpu.memory_space<vmem>>, vector<16x144xbf16>
    %c0_45 = arith.constant 0 : index
    %c0_46 = arith.constant 0 : index
    %142 = vector.load %arg10[%c0_45, %c0_46] : memref<144x512xbf16, #tpu.memory_space<vmem>>, vector<144x512xbf16>
    %cst_47 = arith.constant dense<0.000000e+00> : vector<16x512xf32>
    %143 = tpu.matmul %141, %142, %cst_47 {dimension_numbers = #tpu.dot_dimension_numbers<[1], [0], [0], [1], [0, 0, 1, 1], [], []>} : vector<16x144xbf16>, vector<144x512xbf16>, vector<16x512xf32> -> vector<16x512xf32>
    %144 = vector.broadcast %4 : vector<16x1xf32> to vector<16x512xf32>
    %145 = arith.addf %143, %144 : vector<16x512xf32>
    %cst_48 = arith.constant 0.000000e+00 : f32
    %146 = vector.broadcast %cst_48 : f32 to vector<16x512xf32>
    %147 = arith.maximumf %145, %146 : vector<16x512xf32>
    %148 = arith.truncf %147 : vector<16x512xf32> to vector<16x512xbf16>
    %c0_49 = arith.constant 0 : index
    %c0_50 = arith.constant 0 : index
    %149 = vector.load %arg6[%c0_49, %c0_50] : memref<16x16xbf16, #tpu.memory_space<vmem>>, vector<16x16xbf16>
    %cst_51 = arith.constant dense<0.000000e+00> : vector<16x512xf32>
    %150 = tpu.matmul %149, %148, %cst_51 {dimension_numbers = #tpu.dot_dimension_numbers<[1], [0], [0], [1], [0, 0, 1, 1], [], []>} : vector<16x16xbf16>, vector<16x512xbf16>, vector<16x512xf32> -> vector<16x512xf32>
    %151 = vector.broadcast %5 : vector<16x1xf32> to vector<16x512xf32>
    %152 = arith.addf %150, %151 : vector<16x512xf32>
    %153 = arith.addf %152, %77 : vector<16x512xf32>
    %cst_52 = arith.constant 0.000000e+00 : f32
    %154 = vector.broadcast %cst_52 : f32 to vector<16x512xf32>
    %155 = arith.maximumf %153, %154 : vector<16x512xf32>
    %c0_53 = arith.constant 0 : index
    %c0_54 = arith.constant 0 : index
    %c0_55 = arith.constant 0 : index
    %156 = vector.load %arg8[%c0_53, %c0_54, %c0_55] : memref<1x16x512xf32, #tpu.memory_space<vmem>>, vector<1x16x512xf32>
    %157 = vector.shape_cast %156 : vector<1x16x512xf32> to vector<16x512xf32>
    %158 = vector.shape_cast %155 : vector<16x512xf32> to vector<1x16x512xf32>
    tpu.vector_store %arg8[%c0_53, %c0_54, %c0_55], %158 {strides = array<i32>} : memref<1x16x512xf32, #tpu.memory_space<vmem>>, vector<1x16x512xf32>,
    return
  }
  func.func @transform_0(%arg0: i32) -> (i32, i32, i32) {
    %c0_i32 = arith.constant 0 : i32
    %c0_i32_0 = arith.constant 0 : i32
    %c0_i32_1 = arith.constant 0 : i32
    return %arg0, %c0_i32, %c0_i32_0 : i32, i32, i32
  }
  func.func @transform_1(%arg0: i32) -> (i32, i32) {
    %c0_i32 = arith.constant 0 : i32
    %c0_i32_0 = arith.constant 0 : i32
    %c0_i32_1 = arith.constant 0 : i32
    return %c0_i32, %c0_i32_0 : i32, i32
  }
  func.func @transform_2(%arg0: i32) -> (i32, i32) {
    %c0_i32 = arith.constant 0 : i32
    %c0_i32_0 = arith.constant 0 : i32
    %c0_i32_1 = arith.constant 0 : i32
    return %c0_i32, %c0_i32_0 : i32, i32
  }
  func.func @transform_3(%arg0: i32) -> (i32, i32) {
    %c0_i32 = arith.constant 0 : i32
    %c0_i32_0 = arith.constant 0 : i32
    %c0_i32_1 = arith.constant 0 : i32
    return %c0_i32, %c0_i32_0 : i32, i32
  }
  func.func @transform_4(%arg0: i32) -> (i32, i32) {
    %c0_i32 = arith.constant 0 : i32
    %c0_i32_0 = arith.constant 0 : i32
    %c0_i32_1 = arith.constant 0 : i32
    return %c0_i32, %c0_i32_0 : i32, i32
  }
  func.func @transform_5(%arg0: i32) -> (i32, i32) {
    %c0_i32 = arith.constant 0 : i32
    %c0_i32_0 = arith.constant 0 : i32
    %c0_i32_1 = arith.constant 0 : i32
    return %c0_i32, %c0_i32_0 : i32, i32
  }
  func.func @transform_6(%arg0: i32) -> (i32, i32) {
    %c0_i32 = arith.constant 0 : i32
    %c0_i32_0 = arith.constant 0 : i32
    %c0_i32_1 = arith.constant 0 : i32
    return %c0_i32, %c0_i32_0 : i32, i32
  }
  func.func @transform_7(%arg0: i32) -> (i32, i32, i32) {
    %c0_i32 = arith.constant 0 : i32
    %c0_i32_0 = arith.constant 0 : i32
    %c0_i32_1 = arith.constant 0 : i32
    return %arg0, %c0_i32, %c0_i32_0 : i32, i32, i32
  }
}

</mosaic_0001>

<bundles_post_ra>
// kernel: tpu_custom_call.1
= control target key start
LH: loop header
LB: loop body
LE: loop exit
PB: predicated region body
PF: predicated region fallthrough
CT: control target
= control target key end

     0   :  { %6 = vsyncpa [#allocation3], 0  ;;  %s128_s0 = inlined_call_operand.hbm [shape: f32[8,128], index: 0, kind: input, shape index: {}]   ;;  %s129_s1 = inlined_call_operand.hbm [shape: f32[8,128], index: 1, kind: output, shape index: {}]  }
   0x1   :  { %7 = vsyncpa [#allocation4], 0  ;;  %s91_s6 = smov [#allocation2]   ;;  %s43_s10 = scalar_lea.hbm %s128_s0, 128 }
   0x2   :  { %s14_s7 = sshll.u32 %s91_s6, 4  ;;  %p44_p0 = scmp.ne.s32.totalorder %s128_s0, %s43_s10  ;;  %s15_s7 = int_to_ptr.vmem [resolvable:$true] %s14_s7 }
   0x3   :  { %p47_p1 = scmp.lt.u32.totalorder %s43_s10, %s128_s0 }
   0x5   :  { %p49_p2 = pnand %p47_p1, %p44_p0 }
   0x7   :  { %52 = shalt.err (!%p49_p2)
}
   0x8   :  { %s53_s15 = scalar_lea.vmem %s15_s7, 128  ;;  %p58_p4 = scmp.lt.s32.totalorder %s15_s7, %s15_s7 }
   0x9   :  { %p54_p3 = scmp.ne.s32.totalorder %s15_s7, %s53_s15  ;;  %p59_p5 = scmp.lt.s32.totalorder %s53_s15, %s53_s15 }
   0xb   :  { %p60_p6 = por %p59_p5, %p58_p4 }
   0xd   :  { %p61_p7 = pnand %p60_p6, %p54_p3 }
   0xf   :  { %64 = shalt.err (!%p61_p7)
}
  0x10   :  { %17 = dma.hbm_to_vmem [thread:$0]  %s128_s0, 128, %s15_s7, [#allocation3]  }
  0x11   :  { %87 = dma.done.wait [#allocation3], 128  }
  0x12   :  { %88 = vsyncadd [#allocation3], 4294967168  ;;  %v21_v0 = vld [vmem:[#allocation2] sm:$0xff]  ;;  %s92_s18 = smov 1   ;;  %s93_s19 = smov [#allocation5]  }
  0x13   :  { %22 = vrot.lane.b32.xlu0 %v21_v0, %s92_s18  ;;  %s31_s20 = sshll.u32 %s93_s19, 4  ;;  %s32_s20 = int_to_ptr.vmem [resolvable:$true] %s31_s20 }
  0x14   :  { %s65_s21 = scalar_lea.vmem %s32_s20, 128  ;;  %p70_p9 = scmp.lt.s32.totalorder %s32_s20, %s32_s20 }
  0x15   :  { %p66_p8 = scmp.ne.s32.totalorder %s32_s20, %s65_s21  ;;  %p71_p10 = scmp.lt.s32.totalorder %s65_s21, %s65_s21 }
  0x17   :  { %p72_p11 = por %p71_p10, %p70_p9 }
  0x19   :  { %p73_p12 = pnand %p72_p11, %p66_p8 }
  0x85   :  { %v23_v1 = vpop.permute.xlu0 %22 }
  0x86   :  { %24 = vst [vmem:[#allocation5] sm:$0xff] %v23_v1 }
  0x87   :  { %76 = shalt.err (!%p73_p12)
}
  0x88   :  { %s77_s0 = scalar_lea.hbm %s129_s1, 128 }
  0x89   :  { %p78_p13 = scmp.ne.s32.totalorder %s129_s1, %s77_s0  ;;  %p81_p0 = scmp.lt.u32.totalorder %s77_s0, %s129_s1 }
  0x8b   :  { %p83_p1 = pnand %p81_p0, %p78_p13 }
  0x8d   :  { %86 = shalt.err (!%p83_p1)
}
  0x8e   :  { %34 = dma.vmem_to_hbm [thread:$0]  %s32_s20, 128, %s129_s1, [#allocation4]  }
  0x8f   :  { %89 = dma.done.wait [#allocation4], 128  }
  0x90   :  { %90 = vsyncadd [#allocation4], 4294967168 }
  0x91   :  { %38 = vsyncpa [#allocation3], 1 }
  0x92   :  { %39 = vsyncpa [#allocation4], 1 }

// kernel: tpu_custom_call.1
= control target key start
LH: loop header
LB: loop body
LE: loop exit
PB: predicated region body
PF: predicated region fallthrough
CT: control target
= control target key end

     0   :  { %12 = vsyncpa [#allocation5], 0  ;;  %s2300_s0 = inlined_call_operand.vmem [shape: bf16[1,16,512], index: 0, kind: input, shape index: {}]   ;;  %s2301_s1 = inlined_call_operand.vmem [shape: bf16[9,512], index: 1, kind: input, shape index: {}]   ;;  %s2302_s2 = inlined_call_operand.vmem [shape: bf16[48,144], index: 2, kind: input, shape index: {}]   ;;  %s2303_s3 = inlined_call_operand.vmem [shape: bf16[48,48], index: 3, kind: input, shape index: {}]   ;;  %s2304_s4 = inlined_call_operand.hbm [shape: bf16[16,144], index: 4, kind: input, shape index: {}]   ;;  %s2305_s5 = inlined_call_operand.vmem [shape: bf16[16,16], index: 5, kind: input, shape index: {}]   ;;  %s2306_s6 = inlined_call_operand.vmem [shape: f32[128,1], index: 6, kind: input, shape index: {}]   ;;  %s2307_s7 = inlined_call_operand.hbm [shape: f32[1,16,512], index: 7, kind: output, shape index: {}]  }
   0x1   :  { %13 = vsyncpa [#allocation6], 0  ;;  %s1679_s24 = smov [#allocation4]   ;;  %s1631_s28 = scalar_lea.hbm %s2304_s4, 256 }
   0x2   :  { %s27_s25 = sshll.u32 %s1679_s24, 4  ;;  %p1632_p0 = scmp.ne.s32.totalorder %s2304_s4, %s1631_s28  ;;  %s28_s25 = int_to_ptr.vmem [resolvable:$true] %s27_s25 }
   0x3   :  { %p1635_p1 = scmp.lt.u32.totalorder %s1631_s28, %s2304_s4 }
   0x5   :  { %p1637_p2 = pnand %p1635_p1, %p1632_p0 }
   0x7   :  { %1640 = shalt.err (!%p1637_p2)
}
   0x8   :  { %s1641_s10 = scalar_lea.vmem %s28_s25, 256  ;;  %p1646_p4 = scmp.lt.s32.totalorder %s28_s25, %s28_s25 }
   0x9   :  { %p1642_p3 = scmp.ne.s32.totalorder %s28_s25, %s1641_s10  ;;  %p1647_p5 = scmp.lt.s32.totalorder %s1641_s10, %s1641_s10 }
   0xb   :  { %p1648_p6 = por %p1647_p5, %p1646_p4 }
   0xd   :  { %p1649_p7 = pnand %p1648_p6, %p1642_p3 }
   0xf   :  { %1652 = shalt.err (!%p1649_p7)
}
  0x10   :  { %s1680_s11 = smov 128   ;;  %s1681_s12 = smov 8  }
  0x11   :  { %33 = dma.hbm_to_vmem [thread:$0]  %s2304_s4, 256, %s28_s25, [#allocation5], %s1680_s11, %s1680_s11, %s1681_s12  }
  0x12   :  { %1675 = dma.done.wait [#allocation5], 256  }
  0x13   :  { %1676 = vsyncadd [#allocation5], 4294967040  ;;  %v1749_v0 = vld [vmem:[%s2300_s0 + $0xc] ss:$16 sps:$4 sm:$0xff]   ;;  %v1754_v1 = vld [vmem:[%s2300_s0 + $0x4] ss:$16 sps:$4 sm:$0xff]   ;;  %v115_v16 = vlaneseq }
  0x14   :  { %s1682_s19 = smov 17   ;;  %v1761_v2 = vld [vmem:[%s2300_s0] ss:$16 sps:$4 sm:$0xff]   ;;  %v1768_v3 = vld [vmem:[%s2300_s0 + $0x8] ss:$16 sps:$4 sm:$0xff]   ;;  %s1683_s23 = smov 16  }
  0x15   :  { %71 = vrot.lane.b32.xlu0 %v1749_v0, %s1682_s19  ;;  %86 = vrot.lane.b32.xlu1 %v1754_v1, %s1682_s19  ;;  %s1684_s0 = smov 15   ;;  %s1685_s24 = smov 1   ;;  %v1617_v4 = vld [vmem:[%s2302_s2 + $0x4] ss:$8 sps:$4 sm:$0xff]   ;;  %vm156_vm0 = vcmask 130048   ;;  %v1690_v7 = vmov 0  }
  0x16   :  { %s1686_s25 = smov 127   ;;  %s1687_s26 = smov 113   ;;  %1514 = vmatprep.mubr.msk.bf16.mxu0 %vm156_vm0, %v1617_v4  ;;  %1517 = vmatprep.mubr.msk.bf16.mxu1 %vm156_vm0, %v1617_v4  ;;  %v47_v5 = vld [vmem:[%s2306_s6 + $0x8] sm:$0xff]  ;;  %v46_v6 = vld [vmem:[%s2306_s6] sm:$0xff]  ;;  %v48_v8 = vld [vmem:[%s2306_s6 + $0x10] sm:$0xff]  ;;  %v1873_v19 = vshrl.u32 %v115_v16, 7 }
  0x17   :  { %s1688_s27 = smov 112   ;;  %s1689_s30 = smov 111   ;;  %1600 = vset.pattern.permute.xlu1 %v1690_v7  ;;  %1599 = vset.pattern.permute.xlu0 %v1690_v7  ;;  %v49_v9 = vld [vmem:[%s2306_s6 + $0x18] sm:$0xff]  ;;  %v50_v10 = vld [vmem:[%s2306_s6 + $0x20] sm:$0xff]  ;;  %v51_v11 = vld [vmem:[%s2306_s6 + $0x28] sm:$0xff]  ;;  %vm90_vm1 = vcmask 138240  }
  0x18   :  { %v54_v12 = vld [vmem:[%s2306_s6 + $0x40] sm:$0xff]  ;;  %v55_v13 = vld [vmem:[%s2306_s6 + $0x48] sm:$0xff]  ;;  %v56_v14 = vld [vmem:[%s2306_s6 + $0x50] sm:$0xff]  ;;  %v1876_v24 = vsub.s32 0, %v1873_v19  ;;  %vm212_vm2 = vcmask 121856   ;;  %vm256_vm3 = vcmask 7168  }
  0x19   :  { %84 = vrot.lane.b32.xlu0 %v1761_v2, %s1682_s19  ;;  %88 = vrot.lane.b32.xlu1 %v1768_v3, %s1682_s19  ;;  %v57_v15 = vld [vmem:[%s2306_s6 + $0x58] sm:$0xff]  ;;  %v42_v17 = vld [vmem:[%s2301_s1] sm:$0xff]  ;;  %vm308_vm4 = vcmask 1039360   ;;  %vm352_vm5 = vcmask 924672   ;;  %vm396_vm6 = vcmask 916480   ;;  %vm440_vm7 = vcmask 908288  }
  0x1a   :  { %v43_v18 = vld [vmem:[%s2301_s1 + $0x8] sm:$0xff]  ;;  %v1500_v20 = vcombine.low %v42_v17, %v42_v17  ;;  %v1501_v21 = vcombine.high %v42_v17, %v42_v17  ;;  %vm819_vm8 = vcmask 392192  }
  0x1b   :  { %v1503_v22 = vcombine.high %v43_v18, %v43_v18  ;;  %v1502_v23 = vcombine.low %v43_v18, %v43_v18 }
  0x1c   :  { %v1878_v25 = vpack.i.b16 %v1501_v21, %v1501_v21  ;;  %v1880_v26 = vpack.i.b16 %v1500_v20, %v1500_v20  ;;  %v168_v31 = vshrl.u32 %v1500_v20, 16  ;;  %v175_v32 = vshrl.u32 %v1501_v21, 16 }
  0x1d   :  { %148 = vrot.lane.b32.xlu0 %v1749_v0, %s1683_s23  ;;  %150 = vrot.lane.b32.xlu1 %v1761_v2, %s1683_s23  ;;  %v1882_v27 = vpack.i.b16 %v1503_v22, %v1503_v22  ;;  %v1884_v28 = vpack.i.b16 %v1502_v23, %v1502_v23  ;;  %v189_v36 = vshrl.u32 %v1503_v22, 16  ;;  %v182_v38 = vshrl.u32 %v1502_v23, 16 }
  0x1e   :  { %v1888_v33 = vrot.slane %v1878_v25, %v1876_v24  ;;  %v1892_v34 = vrot.slane %v1880_v26, %v1876_v24  ;;  %v1903_v42 = vpack.i.b16 %v168_v31, %v168_v31  ;;  %v1906_v44 = vpack.i.b16 %v175_v32, %v175_v32 }
  0x1f   :  { %v1896_v35 = vrot.slane %v1882_v27, %v1876_v24  ;;  %v1900_v37 = vrot.slane %v1884_v28, %v1876_v24  ;;  %v1913_v50 = vpack.i.b16 %v189_v36, %v189_v36  ;;  %v1916_v52 = vpack.i.b16 %v182_v38, %v182_v38 }
  0x20   :  { %v1920_v55 = vrot.slane %v1906_v44, %v1876_v24  ;;  %v1924_v56 = vrot.slane %v1903_v42, %v1876_v24 }
  0x21   :  { %152 = vrot.lane.b32.xlu0 %v1754_v1, %s1683_s23  ;;  %154 = vrot.lane.b32.xlu1 %v1768_v3, %s1683_s23  ;;  %v1928_v57 = vrot.slane %v1913_v50, %v1876_v24  ;;  %v1932_v58 = vrot.slane %v1916_v52, %v1876_v24 }
  0x25   :  { %204 = vrot.lane.b32.xlu0 %v1749_v0, %s1684_s0  ;;  %206 = vrot.lane.b32.xlu1 %v1761_v2, %s1684_s0 }
  0x29   :  { %208 = vrot.lane.b32.xlu0 %v1754_v1, %s1684_s0  ;;  %210 = vrot.lane.b32.xlu1 %v1768_v3, %s1684_s0 }
  0x2d   :  { %248 = vrot.lane.b32.xlu0 %v1749_v0, %s1685_s24  ;;  %250 = vrot.lane.b32.xlu1 %v1761_v2, %s1685_s24 }
  0x31   :  { %252 = vrot.lane.b32.xlu0 %v1754_v1, %s1685_s24  ;;  %254 = vrot.lane.b32.xlu1 %v1768_v3, %s1685_s24 }
  0x35   :  { %300 = vrot.lane.b32.xlu0 %v1761_v2, %s1686_s25  ;;  %302 = vrot.lane.b32.xlu1 %v1754_v1, %s1686_s25 }
  0x39   :  { %304 = vrot.lane.b32.xlu0 %v1768_v3, %s1686_s25  ;;  %306 = vrot.lane.b32.xlu1 %v1749_v0, %s1686_s25 }
  0x3d   :  { %344 = vrot.lane.b32.xlu0 %v1761_v2, %s1687_s26  ;;  %346 = vrot.lane.b32.xlu1 %v1754_v1, %s1687_s26 }
  0x41   :  { %348 = vrot.lane.b32.xlu0 %v1768_v3, %s1687_s26  ;;  %350 = vrot.lane.b32.xlu1 %v1749_v0, %s1687_s26 }
  0x45   :  { %388 = vrot.lane.b32.xlu0 %v1761_v2, %s1688_s27  ;;  %390 = vrot.lane.b32.xlu1 %v1754_v1, %s1688_s27 }
  0x49   :  { %392 = vrot.lane.b32.xlu0 %v1768_v3, %s1688_s27  ;;  %394 = vrot.lane.b32.xlu1 %v1749_v0, %s1688_s27 }
  0x4d   :  { %432 = vrot.lane.b32.xlu0 %v1761_v2, %s1689_s30  ;;  %434 = vrot.lane.b32.xlu1 %v1754_v1, %s1689_s30 }
  0x51   :  { %436 = vrot.lane.b32.xlu0 %v1768_v3, %s1689_s30  ;;  %438 = vrot.lane.b32.xlu1 %v1749_v0, %s1689_s30 }
  0x55   :  { %547 = vperm.xlu1 %1600, %v47_v5   ;;  %542 = vperm.xlu0 %1599, %v46_v6  }
  0x59   :  { %552 = vperm.xlu1 %1600, %v48_v8   ;;  %557 = vperm.xlu0 %1599, %v49_v9  }
  0x5d   :  { %562 = vperm.xlu1 %1600, %v50_v10   ;;  %567 = vperm.xlu0 %1599, %v51_v11   ;;  %v226_v10 = vsub.s32 1, %v1873_v19 }
  0x5f   :  { %v1953_v16 = vrot.slane %v1884_v28, %v226_v10 }
  0x61   :  { %786 = vperm.xlu1 %1600, %v54_v12   ;;  %791 = vperm.xlu0 %1599, %v55_v13   ;;  %v1944_v13 = vrot.slane %v1878_v25, %v226_v10 }
  0x65   :  { %796 = vperm.xlu1 %1600, %v56_v14   ;;  %801 = vperm.xlu0 %1599, %v57_v15   ;;  %v1947_v14 = vrot.slane %v1880_v26, %v226_v10  ;;  %v1950_v15 = vrot.slane %v1882_v27, %v226_v10 }
  0x87   :  { %v72_v29 = vpop.permute.xlu0 %71  ;;  %v87_v30 = vpop.permute.xlu1 %86 }
  0x8b   :  { %v85_v39 = vpop.permute.xlu0 %84  ;;  %v89_v40 = vpop.permute.xlu1 %88 }
  0x8c   :  { %v100_v41 = vsel %vm90_vm1, %v72_v29, %v85_v39  ;;  %v91_v43 = vsel %vm90_vm1, %v85_v39, %v87_v30  ;;  %v92_v45 = vsel %vm90_vm1, %v87_v30, %v89_v40  ;;  %v93_v47 = vsel %vm90_vm1, %v89_v40, %v72_v29 }
  0x8d   :  { %v141_v46 = vmul.bf16 %v1888_v33, %v91_v43  ;;  %v140_v48 = vmul.bf16 %v1892_v34, %v100_v41  ;;  %v143_v49 = vmul.bf16 %v1896_v35, %v93_v47  ;;  %v142_v51 = vmul.bf16 %v1900_v37, %v92_v45 }
  0x8e   :  { %v1964_v39 = vrot.slane %v1906_v44, %v226_v10  ;;  %v1967_v40 = vrot.slane %v1903_v42, %v226_v10  ;;  %v1970_v41 = vrot.slane %v1913_v50, %v226_v10  ;;  %v1973_v43 = vrot.slane %v1916_v52, %v226_v10 }
  0x8f   :  { %v149_v53 = vpop.permute.xlu0 %148  ;;  %606 = vmatprep.subr.bf16.mxu0 %v141_v46  ;;  %v151_v54 = vpop.permute.xlu1 %150  ;;  %669 = vmatprep.subr.bf16.mxu1 %v143_v49 }
  0x90   :  { %607 = vmatpush1.bf16.msra.mxu0 %v140_v48  ;;  %670 = vmatpush1.bf16.msra.mxu1 %v142_v51  ;;  %v166_v59 = vsel %vm156_vm0, %v149_v53, %v151_v54 }
  0x91   :  { %v196_v6 = vmul.bf16 %v1924_v56, %v166_v59 }
  0x93   :  { %v153_v60 = vpop.permute.xlu0 %152  ;;  %v155_v61 = vpop.permute.xlu1 %154 }
  0x94   :  { %v157_v62 = vsel %vm156_vm0, %v151_v54, %v153_v60  ;;  %v159_v63 = vsel %vm156_vm0, %v155_v61, %v149_v53  ;;  %v158_v4 = vsel %vm156_vm0, %v153_v60, %v155_v61  ;;  %v322_v61 = vsub.s32 2, %v1873_v19 }
  0x95   :  { %v197_v5 = vmul.bf16 %v1920_v55, %v157_v62  ;;  %v199_v8 = vmul.bf16 %v1928_v57, %v159_v63  ;;  %v198_v9 = vmul.bf16 %v1932_v58, %v158_v4 }
  0x96   :  { %v1985_v4 = vrot.slane %v1906_v44, %v322_v61 }
  0x97   :  { %v205_v11 = vpop.permute.xlu0 %204  ;;  %608 = vmatprep.subr.bf16.mxu0 %v197_v5  ;;  %v207_v12 = vpop.permute.xlu1 %206  ;;  %671 = vmatprep.subr.bf16.mxu1 %v199_v8  ;;  %v1989_v5 = vrot.slane %v1903_v42, %v322_v61  ;;  %v1995_v8 = vrot.slane %v1916_v52, %v322_v61 }
  0x98   :  { %609 = vmatpush1.bf16.msra.mxu0 %v196_v6  ;;  %672 = vmatpush1.bf16.msra.mxu1 %v198_v9  ;;  %v222_v17 = vsel %vm212_vm2, %v205_v11, %v207_v12  ;;  %v1992_v6 = vrot.slane %v1913_v50, %v322_v61 }
  0x99   :  { %v240_v30 = vmul.bf16 %v1947_v14, %v222_v17 }
  0x9b   :  { %v209_v18 = vpop.permute.xlu0 %208  ;;  %v211_v20 = vpop.permute.xlu1 %210 }
  0x9c   :  { %v213_v21 = vsel %vm212_vm2, %v207_v12, %v209_v18  ;;  %v215_v22 = vsel %vm212_vm2, %v211_v20, %v205_v11  ;;  %v214_v23 = vsel %vm212_vm2, %v209_v18, %v211_v20 }
  0x9d   :  { %v241_v29 = vmul.bf16 %v1944_v13, %v213_v21  ;;  %v243_v31 = vmul.bf16 %v1950_v15, %v215_v22  ;;  %v242_v32 = vmul.bf16 %v1953_v16, %v214_v23  ;;  %v366_v22 = vsub.s32 3, %v1873_v19 }
  0x9f   :  { %v249_v36 = vpop.permute.xlu0 %248  ;;  %610 = vmatprep.subr.bf16.mxu0 %v241_v29  ;;  %v251_v38 = vpop.permute.xlu1 %250  ;;  %673 = vmatprep.subr.bf16.mxu1 %v243_v31  ;;  %v2019_v31 = vrot.slane %v1884_v28, %v366_v22  ;;  %v2039_v61 = vrot.slane %v1903_v42, %v366_v22 }
  0xa0   :  { %611 = vmatpush1.bf16.msra.mxu0 %v240_v30  ;;  %674 = vmatpush1.bf16.msra.mxu1 %v242_v32  ;;  %v266_v45 = vsel %vm256_vm3, %v249_v36, %v251_v38  ;;  %v2016_v30 = vrot.slane %v1882_v27, %v366_v22  ;;  %v45_v27 = vld [vmem:[%s2301_s1 + $0x18] sm:$0x11] }
  0xa1   :  { %v284_v54 = vmul.bf16 %v1967_v40, %v266_v45 }
  0xa3   :  { %v253_v46 = vpop.permute.xlu0 %252  ;;  %v255_v47 = vpop.permute.xlu1 %254 }
  0xa4   :  { %v257_v48 = vsel %vm256_vm3, %v251_v38, %v253_v46  ;;  %v259_v49 = vsel %vm256_vm3, %v255_v47, %v249_v36  ;;  %v258_v51 = vsel %vm256_vm3, %v253_v46, %v255_v47 }
  0xa5   :  { %v285_v53 = vmul.bf16 %v1964_v39, %v257_v48  ;;  %v287_v59 = vmul.bf16 %v1970_v41, %v259_v49  ;;  %v286_v60 = vmul.bf16 %v1973_v43, %v258_v51 }
  0xa7   :  { %v301_v62 = vpop.permute.xlu0 %300  ;;  %612 = vmatprep.subr.bf16.mxu0 %v285_v53  ;;  %v303_v63 = vpop.permute.xlu1 %302  ;;  %675 = vmatprep.subr.bf16.mxu1 %v287_v59  ;;  %v2036_v59 = vrot.slane %v1906_v44, %v366_v22 }
  0xa8   :  { %613 = vmatpush1.bf16.msra.mxu0 %v284_v54  ;;  %676 = vmatpush1.bf16.msra.mxu1 %v286_v60  ;;  %v309_v9 = vsel %vm308_vm4, %v301_v62, %v303_v63  ;;  %v1507_v54 = vcombine.high %v45_v27, %v45_v27 }
  0xa9   :  { %614 = vmatprep.subr.bf16.mxu0 %v1754_v1  ;;  %677 = vmatprep.subr.bf16.mxu1 %v1749_v0  ;;  %v336_v20 = vmul.bf16 %v1989_v5, %v309_v9  ;;  %v1506_v9 = vcombine.low %v45_v27, %v45_v27 }
  0xaa   :  { %v484_v44 = vpack.i.b16 %v1507_v54, %v1507_v54  ;;  %v1620_v54 = vld [vmem:[%s2302_s2 + $0x10] ss:$8 sps:$4 sm:$0xff]  }
  0xab   :  { %v305_v10 = vpop.permute.xlu0 %304  ;;  %v307_v11 = vpop.permute.xlu1 %306 }
  0xac   :  { %v310_v12 = vsel %vm308_vm4, %v303_v63, %v305_v10  ;;  %615 = vmatpush1.bf16.msra.mxu0 %v1761_v2  ;;  %v318_v1 = vsel %vm308_vm4, %v307_v11, %v301_v62  ;;  %v311_v17 = vsel %vm308_vm4, %v305_v10, %v307_v11  ;;  %678 = vmatpush1.bf16.msra.mxu1 %v1768_v3 }
  0xad   :  { %v337_v18 = vmul.bf16 %v1985_v4, %v310_v12  ;;  %v339_v0 = vmul.bf16 %v1992_v6, %v318_v1  ;;  %v338_v21 = vmul.bf16 %v1995_v8, %v311_v17  ;;  %v2010_v2 = vrot.slane %v1878_v25, %v366_v22 }
  0xae   :  { %v2013_v3 = vrot.slane %v1880_v26, %v366_v22  ;;  %v44_v26 = vld [vmem:[%s2301_s1 + $0x10] sm:$0x11]  ;;  %v2042_v62 = vrot.slane %v1913_v50, %v366_v22  ;;  %v2045_v63 = vrot.slane %v1916_v52, %v366_v22  ;;  %v477_v22 = vpack.i.b16 %v1506_v9, %v1506_v9  ;;  %v1623_v9 = vld [vmem:[%s2302_s2 + $0x20] ss:$8 sps:$4 sm:$0xff]  }
  0xaf   :  { %v345_v23 = vpop.permute.xlu0 %344  ;;  %616 = vmatprep.subr.bf16.mxu0 %v337_v18  ;;  %v347_v29 = vpop.permute.xlu1 %346  ;;  %679 = vmatprep.subr.bf16.mxu1 %v339_v0  ;;  %v1504_v53 = vcombine.low %v44_v26, %v44_v26  ;;  %v1505_v60 = vcombine.high %v44_v26, %v44_v26 }
  0xb0   :  { %617 = vmatpush1.bf16.msra.mxu0 %v336_v20  ;;  %680 = vmatpush1.bf16.msra.mxu1 %v338_v21  ;;  %v353_v19 = vsel %vm352_vm5, %v345_v23, %v347_v29 }
  0xb1   :  { %v380_v28 = vmul.bf16 %v2013_v3, %v353_v19  ;;  %v463_v17 = vpack.i.b16 %v1504_v53, %v1504_v53  ;;  %v470_v50 = vpack.i.b16 %v1505_v60, %v1505_v60  ;;  %v1618_v53 = vld [vmem:[%s2302_s2 + $0x14] ss:$8 sps:$4 sm:$0xff]   ;;  %v1621_v60 = vld [vmem:[%s2302_s2 + $0x24] ss:$8 sps:$4 sm:$0xff]  }
  0xb3   :  { %v349_v32 = vpop.permute.xlu0 %348  ;;  %v351_v36 = vpop.permute.xlu1 %350  ;;  %v2056_v19 = vrot.slane %v470_v50, %v1876_v24 }
  0xb4   :  { %v354_v38 = vsel %vm352_vm5, %v347_v29, %v349_v32  ;;  %v362_v45 = vsel %vm352_vm5, %v351_v36, %v345_v23  ;;  %v355_v25 = vsel %vm352_vm5, %v349_v32, %v351_v36  ;;  %v2059_v32 = vrot.slane %v463_v17, %v1876_v24 }
  0xb5   :  { %v381_v46 = vmul.bf16 %v2010_v2, %v354_v38  ;;  %v383_v47 = vmul.bf16 %v2016_v30, %v362_v45  ;;  %v382_v48 = vmul.bf16 %v2019_v31, %v355_v25  ;;  %v2062_v36 = vrot.slane %v484_v44, %v1876_v24 }
  0xb6   :  { %v2065_v38 = vrot.slane %v477_v22, %v1876_v24  ;;  %v1615_v24 = vld [vmem:[%s2302_s2] ss:$8 sps:$4 sm:$0xff]  }
  0xb7   :  { %v389_v49 = vpop.permute.xlu0 %388  ;;  %618 = vmatprep.subr.bf16.mxu0 %v381_v46  ;;  %v391_v51 = vpop.permute.xlu1 %390  ;;  %681 = vmatprep.subr.bf16.mxu1 %v383_v47 }
  0xb8   :  { %619 = vmatpush1.bf16.msra.mxu0 %v380_v28  ;;  %682 = vmatpush1.bf16.msra.mxu1 %v382_v48  ;;  %v397_v10 = vsel %vm396_vm6, %v389_v49, %v391_v51 }
  0xb9   :  { %v424_v0 = vmul.bf16 %v2039_v61, %v397_v10 }
  0xbb   :  { %v393_v11 = vpop.permute.xlu0 %392  ;;  %v395_v12 = vpop.permute.xlu1 %394 }
  0xbc   :  { %v398_v1 = vsel %vm396_vm6, %v391_v51, %v393_v11  ;;  %v406_v18 = vsel %vm396_vm6, %v395_v12, %v389_v49  ;;  %v399_v42 = vsel %vm396_vm6, %v393_v11, %v395_v12 }
  0xbd   :  { %v425_v20 = vmul.bf16 %v2036_v59, %v398_v1  ;;  %v427_v52 = vmul.bf16 %v2042_v62, %v406_v18  ;;  %v426_v21 = vmul.bf16 %v2045_v63, %v399_v42 }
  0xbf   :  { %v433_v23 = vpop.permute.xlu0 %432  ;;  %620 = vmatprep.subr.bf16.mxu0 %v425_v20  ;;  %v435_v29 = vpop.permute.xlu1 %434  ;;  %683 = vmatprep.subr.bf16.mxu1 %v427_v52 }
  0xc0   :  { %621 = vmatpush1.bf16.msra.mxu0 %v424_v0  ;;  %684 = vmatpush1.bf16.msra.mxu1 %v426_v21  ;;  %v441_v45 = vsel %vm440_vm7, %v433_v23, %v435_v29 }
  0xc1   :  { %v490_v48 = vmul.bf16 %v2059_v32, %v441_v45 }
  0xc3   :  { %v437_v25 = vpop.permute.xlu0 %436  ;;  %v439_v46 = vpop.permute.xlu1 %438 }
  0xc4   :  { %v442_v26 = vsel %vm440_vm7, %v435_v29, %v437_v25  ;;  %v450_v27 = vsel %vm440_vm7, %v439_v46, %v433_v23  ;;  %v443_v28 = vsel %vm440_vm7, %v437_v25, %v439_v46 }
  0xc5   :  { %v491_v47 = vmul.bf16 %v2056_v19, %v442_v26  ;;  %v493_v49 = vmul.bf16 %v2062_v36, %v450_v27  ;;  %v492_v51 = vmul.bf16 %v2065_v38, %v443_v28 }
  0xc7   :  { %622 = vmatprep.subr.bf16.mxu0 %v491_v47  ;;  %685 = vmatprep.subr.bf16.mxu1 %v493_v49 }
  0xc8   :  { %623 = vmatpush1.bf16.msra.mxu0 %v490_v48  ;;  %686 = vmatpush1.bf16.msra.mxu1 %v492_v51 }
  0xcb   :  { %639 = vmatmul.mubr.bf16.vlgmr.msra.gmra.mrb[0].mxu0 %v1615_v24  ;;  %702 = vmatmul.mubr.bf16.vlgmr.msra.gmra.mrb[0].mxu1 %v1615_v24 }
  0xcc   :  { %1515 = vmatprep.mubr.msk.bf16.mxu0 %vm156_vm0, %v1618_v53  ;;  %1518 = vmatprep.mubr.msk.bf16.mxu1 %vm156_vm0, %v1618_v53 }
  0xd3   :  { %649 = vmatmul.mubr.bf16.gmra.mrb[4].mxu0 %v1620_v54  ;;  %712 = vmatmul.mubr.bf16.gmra.mrb[4].mxu1 %v1620_v54 }
  0xd4   :  { %1516 = vmatprep.mubr.msk.bf16.mxu0 %vm156_vm0, %v1621_v60  ;;  %1519 = vmatprep.mubr.msk.bf16.mxu1 %vm156_vm0, %v1621_v60  ;;  %v548_v10 = vpop.permute.xlu1 %547  ;;  %v543_v11 = vpop.permute.xlu0 %542 }
  0xd8   :  { %v553_v51 = vpop.permute.xlu1 %552  ;;  %v558_v54 = vpop.permute.xlu0 %557 }
  0xdb   :  { %659 = vmatmul.mubr.bf16.gmra.mrb[8].mxu0 %v1623_v9  ;;  %722 = vmatmul.mubr.bf16.gmra.mrb[8].mxu1 %v1623_v9 }
  0xdc   :  { %861 = vmatprep.mubr.bf16.mxu0 %v1690_v7  ;;  %924 = vmatprep.mubr.bf16.mxu1 %v1690_v7 }
 0x19e   :  { %v640_v12 = vpop.f32.mrb[0].mxu0  ;;  %v703_v17 = vpop.f32.mrb[0].mxu1 }
 0x19f   :  { %v641_v1 = vadd.f32 %v640_v12, %v543_v11  ;;  %v642_v44 = vpop.f32.mrb[1].mxu0  ;;  %v704_v18 = vadd.f32 %v703_v17, %v543_v11  ;;  %v705_v20 = vpop.f32.mrb[1].mxu1 }
 0x1a0   :  { %v643_v42 = vadd.f32 %v642_v44, %v543_v11  ;;  %v644_v50 = vpop.f32.mrb[2].mxu0  ;;  %v706_v0 = vadd.f32 %v705_v20, %v543_v11  ;;  %v707_v21 = vpop.f32.mrb[2].mxu1 }
 0x1a1   :  { %v645_v52 = vadd.f32 %v644_v50, %v548_v10  ;;  %v646_v22 = vpop.f32.mrb[3].mxu0  ;;  %v734_v23 = vmax.f32 %v704_v18, 0.0  ;;  %v708_v29 = vadd.f32 %v707_v21, %v548_v10  ;;  %v709_v25 = vpop.f32.mrb[3].mxu1  ;;  %v732_v46 = vmax.f32 %v641_v1, 0.0 }
 0x1a2   :  { %v647_v45 = vadd.f32 %v646_v22, %v548_v10  ;;  %v735_v26 = vmax.f32 %v706_v0, 0.0  ;;  %v710_v28 = vadd.f32 %v709_v25, %v548_v10  ;;  %v733_v47 = vmax.f32 %v643_v42, 0.0 }
 0x1a3   :  { %v736_v27 = vmax.f32 %v645_v52, 0.0  ;;  %v738_v48 = vmax.f32 %v708_v29, 0.0 }
 0x1a4   :  { %v737_v49 = vmax.f32 %v647_v45, 0.0  ;;  %v739_v53 = vmax.f32 %v710_v28, 0.0 }
 0x1a5   :  { %v756_v24 = vpack.c.bf16 %v736_v27, %v732_v46  ;;  %v758_v60 = vpack.c.bf16 %v738_v48, %v734_v23 }
 0x1a6   :  { %v757_v9 = vpack.c.bf16 %v737_v49, %v733_v47  ;;  %v650_v11 = vpop.f32.mrb[4].mxu0  ;;  %v759_v12 = vpack.c.bf16 %v739_v53, %v735_v26  ;;  %v713_v44 = vpop.f32.mrb[4].mxu1 }
 0x1a7   :  { %v651_v17 = vadd.f32 %v650_v11, %v553_v51  ;;  %v652_v18 = vpop.f32.mrb[5].mxu0  ;;  %v714_v20 = vadd.f32 %v713_v44, %v553_v51  ;;  %v715_v1 = vpop.f32.mrb[5].mxu1 }
 0x1a8   :  { %v653_v50 = vadd.f32 %v652_v18, %v553_v51  ;;  %v654_v0 = vpop.f32.mrb[6].mxu0  ;;  %829 = vmatprep.subr.bf16.mxu0 %v757_v9  ;;  %v716_v10 = vadd.f32 %v715_v1, %v553_v51  ;;  %v717_v52 = vpop.f32.mrb[6].mxu1  ;;  %892 = vmatprep.subr.bf16.mxu1 %v759_v12 }
 0x1a9   :  { %v655_v42 = vadd.f32 %v654_v0, %v558_v54  ;;  %v656_v21 = vpop.f32.mrb[7].mxu0  ;;  %830 = vmatpush1.bf16.msra.mxu0 %v756_v24  ;;  %v742_v22 = vmax.f32 %v714_v20, 0.0  ;;  %v718_v29 = vadd.f32 %v717_v52, %v558_v54  ;;  %v719_v45 = vpop.f32.mrb[7].mxu1  ;;  %893 = vmatpush1.bf16.msra.mxu1 %v758_v60  ;;  %v740_v25 = vmax.f32 %v651_v17, 0.0 }
 0x1aa   :  { %v657_v23 = vadd.f32 %v656_v21, %v558_v54  ;;  %v743_v46 = vmax.f32 %v716_v10, 0.0  ;;  %v720_v27 = vadd.f32 %v719_v45, %v558_v54  ;;  %v741_v28 = vmax.f32 %v653_v50, 0.0  ;;  %v563_v49 = vpop.permute.xlu1 %562  ;;  %v568_v9 = vpop.permute.xlu0 %567 }
 0x1ab   :  { %v744_v26 = vmax.f32 %v655_v42, 0.0  ;;  %v746_v47 = vmax.f32 %v718_v29, 0.0 }
 0x1ac   :  { %v745_v48 = vmax.f32 %v657_v23, 0.0  ;;  %v747_v51 = vmax.f32 %v720_v27, 0.0 }
 0x1ad   :  { %v760_v53 = vpack.c.bf16 %v744_v26, %v740_v25  ;;  %v762_v11 = vpack.c.bf16 %v746_v47, %v742_v22 }
 0x1ae   :  { %v761_v12 = vpack.c.bf16 %v745_v48, %v741_v28  ;;  %v660_v44 = vpop.f32.mrb[8].mxu0  ;;  %v763_v24 = vpack.c.bf16 %v747_v51, %v743_v46  ;;  %v723_v20 = vpop.f32.mrb[8].mxu1 }
 0x1af   :  { %v661_v18 = vadd.f32 %v660_v44, %v563_v49  ;;  %v662_v1 = vpop.f32.mrb[9].mxu0  ;;  %v724_v0 = vadd.f32 %v723_v20, %v563_v49  ;;  %v725_v17 = vpop.f32.mrb[9].mxu1 }
 0x1b0   :  { %v663_v60 = vadd.f32 %v662_v1, %v563_v49  ;;  %v664_v10 = vpop.f32.mrb[10].mxu0  ;;  %831 = vmatprep.subr.bf16.mxu0 %v761_v12  ;;  %v726_v54 = vadd.f32 %v725_v17, %v563_v49  ;;  %v727_v42 = vpop.f32.mrb[10].mxu1  ;;  %894 = vmatprep.subr.bf16.mxu1 %v763_v24 }
 0x1b1   :  { %v665_v50 = vadd.f32 %v664_v10, %v568_v9  ;;  %v666_v52 = vpop.f32.mrb[11].mxu0  ;;  %832 = vmatpush1.bf16.msra.mxu0 %v760_v53  ;;  %v728_v21 = vadd.f32 %v727_v42, %v568_v9  ;;  %v729_v22 = vpop.f32.mrb[11].mxu1  ;;  %895 = vmatpush1.bf16.msra.mxu1 %v762_v11  ;;  %v748_v23 = vmax.f32 %v661_v18, 0.0  ;;  %v750_v46 = vmax.f32 %v724_v0, 0.0  ;;  %v1624_v53 = vld [vmem:[%s2303_s3] sm:$0xff]   ;;  %v1626_v11 = vld [vmem:[%s2303_s3 + $0x10] sm:$0xff]  }
 0x1b2   :  { %v667_v29 = vadd.f32 %v666_v52, %v568_v9  ;;  %v730_v25 = vadd.f32 %v729_v22, %v568_v9  ;;  %v749_v26 = vmax.f32 %v663_v60, 0.0  ;;  %v751_v47 = vmax.f32 %v726_v54, 0.0  ;;  %v1625_v9 = vld [vmem:[%s2303_s3 + $0x8] sm:$0xff]   ;;  %v787_v24 = vpop.permute.xlu1 %786  ;;  %v792_v18 = vpop.permute.xlu0 %791 }
 0x1b3   :  { %v752_v45 = vmax.f32 %v665_v50, 0.0  ;;  %v754_v27 = vmax.f32 %v728_v21, 0.0 }
 0x1b4   :  { %v753_v28 = vmax.f32 %v667_v29, 0.0  ;;  %v755_v51 = vmax.f32 %v730_v25, 0.0 }
 0x1b5   :  { %v764_v48 = vpack.c.bf16 %v752_v45, %v748_v23  ;;  %v766_v49 = vpack.c.bf16 %v754_v27, %v750_v46 }
 0x1b6   :  { %v765_v12 = vpack.c.bf16 %v753_v28, %v749_v26  ;;  %v767_v44 = vpack.c.bf16 %v755_v51, %v751_v47  ;;  %v797_v20 = vpop.permute.xlu1 %796  ;;  %v802_v1 = vpop.permute.xlu0 %801 }
 0x1b7   :  { %v1544_v0 = vadd.f32 %v797_v20, %v787_v24  ;;  %v1548_v17 = vadd.f32 %v802_v1, %v792_v18  ;;  %v1629_v1 = vld [vmem:[#allocation4 + $0x4] ss:$8 sps:$4 sm:$0xff]  }
 0x1b8   :  { %833 = vmatprep.subr.bf16.mxu0 %v765_v12  ;;  %896 = vmatprep.subr.bf16.mxu1 %v767_v44 }
 0x1b9   :  { %834 = vmatpush1.bf16.msra.mxu0 %v764_v48  ;;  %897 = vmatpush1.bf16.msra.mxu1 %v766_v49 }
 0x1bc   :  { %1523 = vmatmul.mubr.msk.bf16.vlgmr.msra.gmra.mrb[12].mxu0 %vm819_vm8, %v1624_v53  ;;  %1526 = vmatmul.mubr.msk.bf16.vlgmr.msra.gmra.mrb[12].mxu1 %vm819_vm8, %v1624_v53 }
 0x1bd   :  { %871 = vmatprep.mubr.bf16.mxu0 %v1690_v7  ;;  %934 = vmatprep.mubr.bf16.mxu1 %v1690_v7 }
 0x1c4   :  { %1524 = vmatmul.mubr.msk.bf16.gmra.mrb[16].mxu0 %vm819_vm8, %v1625_v9  ;;  %1527 = vmatmul.mubr.msk.bf16.gmra.mrb[16].mxu1 %vm819_vm8, %v1625_v9 }
 0x1c5   :  { %881 = vmatprep.mubr.bf16.mxu0 %v1690_v7  ;;  %944 = vmatprep.mubr.bf16.mxu1 %v1690_v7 }
 0x1d0   :  { %1525 = vmatmul.mubr.msk.bf16.gmra.mrb[16].mxu0 %vm819_vm8, %v1626_v11  ;;  %1528 = vmatmul.mubr.msk.bf16.gmra.mrb[16].mxu1 %vm819_vm8, %v1626_v11 }
 0x1d1   :  { %1531 = vmatprep.mubr.msk.bf16.mxu0 %vm156_vm0, %v1629_v1  ;;  %1532 = vmatprep.mubr.msk.bf16.mxu1 %vm156_vm0, %v1629_v1 }
 0x2a3   :  { %v883_v60 = vpop.f32.mrb[16].mxu0  ;;  %v946_v54 = vpop.f32.mrb[16].mxu1 }
 0x2a4   :  { %v1545_v10 = vadd.f32 %v1544_v0, %v883_v60  ;;  %v885_v50 = vpop.f32.mrb[17].mxu0  ;;  %v1561_v42 = vadd.f32 %v1544_v0, %v946_v54  ;;  %v948_v21 = vpop.f32.mrb[17].mxu1  ;;  %v58_v60 = vld [vmem:[%s2306_s6 + $0x60] sm:$0xff]  ;;  %v61_v54 = vld [vmem:[%s2306_s6 + $0x78] sm:$0xff] }
 0x2a5   :  { %v1547_v52 = vadd.f32 %v1544_v0, %v885_v50  ;;  %v887_v29 = vpop.f32.mrb[18].mxu0  ;;  %v1563_v22 = vadd.f32 %v1544_v0, %v948_v21  ;;  %v950_v45 = vpop.f32.mrb[18].mxu1  ;;  %v59_v0 = vld [vmem:[%s2306_s6 + $0x68] sm:$0xff]  ;;  %v60_v50 = vld [vmem:[%s2306_s6 + $0x70] sm:$0xff] }
 0x2a6   :  { %v1549_v23 = vadd.f32 %v1548_v17, %v887_v29  ;;  %v889_v25 = vpop.f32.mrb[19].mxu0  ;;  %v1565_v46 = vadd.f32 %v1548_v17, %v950_v45  ;;  %v952_v27 = vpop.f32.mrb[19].mxu1  ;;  %v963_v28 = vmax.f32 %v1545_v10, 0.0  ;;  %v965_v51 = vmax.f32 %v1561_v42, 0.0  ;;  %v52_v10 = vld [vmem:[%s2306_s6 + $0x30] sm:$0xff] }
 0x2a7   :  { %v1551_v26 = vadd.f32 %v1548_v17, %v889_v25  ;;  %v1567_v48 = vadd.f32 %v1548_v17, %v952_v27  ;;  %v964_v49 = vmax.f32 %v1547_v52, 0.0  ;;  %v966_v53 = vmax.f32 %v1563_v22, 0.0  ;;  %v53_v17 = vld [vmem:[%s2306_s6 + $0x38] sm:$0xff] }
 0x2a8   :  { %v967_v47 = vmax.f32 %v1549_v23, 0.0  ;;  %v969_v12 = vmax.f32 %v1565_v46, 0.0 }
 0x2a9   :  { %v968_v44 = vmax.f32 %v1551_v26, 0.0  ;;  %v970_v11 = vmax.f32 %v1567_v48, 0.0 }
 0x2aa   :  { %v2109_v9 = vpack.c.bf16 %v967_v47, %v963_v28  ;;  %v2111_v24 = vpack.c.bf16 %v969_v12, %v965_v51 }
 0x2ab   :  { %v2113_v18 = vpack.c.bf16 %v968_v44, %v964_v49  ;;  %v2115_v20 = vpack.c.bf16 %v970_v11, %v966_v53 }
 0x2ac   :  { %1087 = vrot.lane.b32.xlu1 %v2109_v9, %s1686_s25  ;;  %981 = vrot.lane.b32.xlu0 %v2109_v9, %s1682_s19 }
 0x2b0   :  { %1091 = vrot.lane.b32.xlu1 %v2111_v24, %s1686_s25  ;;  %985 = vrot.lane.b32.xlu0 %v2111_v24, %s1682_s19 }
 0x2b4   :  { %1113 = vrot.lane.b32.xlu1 %v2109_v9, %s1687_s26  ;;  %1007 = vrot.lane.b32.xlu0 %v2109_v9, %s1683_s23 }
 0x2b8   :  { %976 = vrot.lane.b32.xlu1 %v2115_v20, %s1682_s19  ;;  %1011 = vrot.lane.b32.xlu0 %v2111_v24, %s1683_s23 }
 0x2bc   :  { %1033 = vrot.lane.b32.xlu0 %v2109_v9, %s1684_s0  ;;  %983 = vrot.lane.b32.xlu1 %v2113_v18, %s1682_s19 }
 0x2c0   :  { %1037 = vrot.lane.b32.xlu0 %v2111_v24, %s1684_s0  ;;  %1005 = vrot.lane.b32.xlu1 %v2115_v20, %s1683_s23 }
 0x2c4   :  { %1059 = vrot.lane.b32.xlu0 %v2109_v9, %s1685_s24  ;;  %1009 = vrot.lane.b32.xlu1 %v2113_v18, %s1683_s23 }
 0x2c8   :  { %1063 = vrot.lane.b32.xlu0 %v2111_v24, %s1685_s24  ;;  %1031 = vrot.lane.b32.xlu1 %v2115_v20, %s1684_s0 }
 0x2cc   :  { %1089 = vrot.lane.b32.xlu0 %v2113_v18, %s1686_s25  ;;  %1035 = vrot.lane.b32.xlu1 %v2113_v18, %s1684_s0 }
 0x2d0   :  { %1093 = vrot.lane.b32.xlu0 %v2115_v20, %s1686_s25  ;;  %1057 = vrot.lane.b32.xlu1 %v2115_v20, %s1685_s24 }
 0x2d4   :  { %1115 = vrot.lane.b32.xlu0 %v2113_v18, %s1687_s26  ;;  %1061 = vrot.lane.b32.xlu1 %v2113_v18, %s1685_s24 }
 0x2d8   :  { %1119 = vrot.lane.b32.xlu0 %v2115_v20, %s1687_s26  ;;  %1117 = vrot.lane.b32.xlu1 %v2111_v24, %s1687_s26 }
 0x2dc   :  { %1141 = vrot.lane.b32.xlu0 %v2113_v18, %s1688_s27  ;;  %1139 = vrot.lane.b32.xlu1 %v2109_v9, %s1688_s27 }
 0x2e0   :  { %1145 = vrot.lane.b32.xlu0 %v2115_v20, %s1688_s27  ;;  %1143 = vrot.lane.b32.xlu1 %v2111_v24, %s1688_s27 }
 0x2e4   :  { %1167 = vrot.lane.b32.xlu0 %v2113_v18, %s1689_s30  ;;  %1165 = vrot.lane.b32.xlu1 %v2109_v9, %s1689_s30 }
 0x2e8   :  { %1171 = vrot.lane.b32.xlu0 %v2115_v20, %s1689_s30  ;;  %1169 = vrot.lane.b32.xlu1 %v2111_v24, %s1689_s30 }
 0x2ec   :  { %1236 = vperm.xlu0 %1599, %v59_v0   ;;  %1231 = vperm.xlu1 %1600, %v58_v60  }
 0x2f0   :  { %781 = vperm.xlu0 %1599, %v53_v17   ;;  %776 = vperm.xlu1 %1600, %v52_v10  }
 0x2f4   :  { %1358 = vperm.xlu0 %1599, %v61_v54   ;;  %1353 = vperm.xlu1 %1600, %v60_v50  }
 0x31e   :  { %v2201_v42 = vpop.permute.xlu1 %1087  ;;  %v982_v52 = vpop.permute.xlu0 %981 }
 0x322   :  { %v2203_v21 = vpop.permute.xlu1 %1091  ;;  %v986_v29 = vpop.permute.xlu0 %985 }
 0x326   :  { %v2205_v22 = vpop.permute.xlu1 %1113  ;;  %v1008_v23 = vpop.permute.xlu0 %1007 }
 0x32a   :  { %v977_v45 = vpop.permute.xlu1 %976  ;;  %v1012_v25 = vpop.permute.xlu0 %1011 }
 0x32b   :  { %v989_v46 = vsel %vm90_vm1, %v986_v29, %v977_v45  ;;  %v995_v27 = vsel %vm90_vm1, %v977_v45, %v982_v52 }
 0x32c   :  { %v1000_v26 = vmul.bf16 %v989_v46, %v1896_v35  ;;  %v997_v44 = vmul.bf16 %v995_v27, %v1892_v34 }
 0x32e   :  { %1294 = vmatprep.subr.bf16.mxu1 %v1000_v26  ;;  %v1034_v28 = vpop.permute.xlu0 %1033  ;;  %v984_v47 = vpop.permute.xlu1 %983 }
 0x32f   :  { %v987_v48 = vsel %vm90_vm1, %v982_v52, %v984_v47  ;;  %v988_v51 = vsel %vm90_vm1, %v984_v47, %v986_v29 }
 0x330   :  { %v998_v49 = vmul.bf16 %v987_v48, %v1888_v33  ;;  %v999_v12 = vmul.bf16 %v988_v51, %v1900_v37 }
 0x332   :  { %v1038_v53 = vpop.permute.xlu0 %1037  ;;  %1251 = vmatprep.subr.bf16.mxu0 %v998_v49  ;;  %1295 = vmatpush1.bf16.msra.mxu1 %v999_v12  ;;  %v1006_v11 = vpop.permute.xlu1 %1005 }
 0x333   :  { %v1015_v35 = vsel %vm156_vm0, %v1012_v25, %v1006_v11  ;;  %1252 = vmatpush1.bf16.msra.mxu0 %v997_v44  ;;  %v1021_v0 = vsel %vm156_vm0, %v1006_v11, %v1008_v23 }
 0x334   :  { %v1026_v1 = vmul.bf16 %v1015_v35, %v1928_v57  ;;  %v1023_v54 = vmul.bf16 %v1021_v0, %v1924_v56 }
 0x336   :  { %v1060_v60 = vpop.permute.xlu0 %1059  ;;  %1296 = vmatprep.subr.bf16.mxu1 %v1026_v1  ;;  %v1010_v17 = vpop.permute.xlu1 %1009 }
 0x337   :  { %v1013_v33 = vsel %vm156_vm0, %v1008_v23, %v1010_v17  ;;  %v1014_v37 = vsel %vm156_vm0, %v1010_v17, %v1012_v25 }
 0x338   :  { %v1024_v34 = vmul.bf16 %v1013_v33, %v1920_v55  ;;  %v1025_v10 = vmul.bf16 %v1014_v37, %v1932_v58 }
 0x33a   :  { %v1064_v50 = vpop.permute.xlu0 %1063  ;;  %1253 = vmatprep.subr.bf16.mxu0 %v1024_v34  ;;  %1297 = vmatpush1.bf16.msra.mxu1 %v1025_v10  ;;  %v1032_v52 = vpop.permute.xlu1 %1031 }
 0x33b   :  { %v1041_v57 = vsel %vm212_vm2, %v1038_v53, %v1032_v52  ;;  %1254 = vmatpush1.bf16.msra.mxu0 %v1023_v54  ;;  %v1047_v45 = vsel %vm212_vm2, %v1032_v52, %v1034_v28 }
 0x33c   :  { %v1052_v29 = vmul.bf16 %v1041_v57, %v1950_v15  ;;  %v1049_v26 = vmul.bf16 %v1047_v45, %v1947_v14 }
 0x33e   :  { %v1090_v23 = vpop.permute.xlu0 %1089  ;;  %1298 = vmatprep.subr.bf16.mxu1 %v1052_v29  ;;  %v1036_v25 = vpop.permute.xlu1 %1035 }
 0x33f   :  { %v1039_v55 = vsel %vm212_vm2, %v1034_v28, %v1036_v25  ;;  %v1040_v58 = vsel %vm212_vm2, %v1036_v25, %v1038_v53  ;;  %v1096_v35 = vsel %vm308_vm4, %v1090_v23, %v2203_v21 }
 0x340   :  { %v1050_v56 = vmul.bf16 %v1039_v55, %v1944_v13  ;;  %v1051_v46 = vmul.bf16 %v1040_v58, %v1953_v16  ;;  %v1106_v1 = vmul.bf16 %v1096_v35, %v1985_v4  ;;  %v1627_v55 = vld [vmem:[#allocation4] ss:$8 sps:$4 sm:$0xff]  }
 0x342   :  { %v1094_v27 = vpop.permute.xlu0 %1093  ;;  %1255 = vmatprep.subr.bf16.mxu0 %v1050_v56  ;;  %1299 = vmatpush1.bf16.msra.mxu1 %v1051_v46  ;;  %v1058_v47 = vpop.permute.xlu1 %1057 }
 0x343   :  { %v1067_v15 = vsel %vm256_vm3, %v1064_v50, %v1058_v47  ;;  %1256 = vmatpush1.bf16.msra.mxu0 %v1049_v26  ;;  %v1073_v51 = vsel %vm256_vm3, %v1058_v47, %v1060_v60  ;;  %v1103_v53 = vsel %vm308_vm4, %v1094_v27, %v2201_v42 }
 0x344   :  { %v1078_v48 = vmul.bf16 %v1067_v15, %v1970_v41  ;;  %v1075_v44 = vmul.bf16 %v1073_v51, %v1967_v40  ;;  %v1108_v40 = vmul.bf16 %v1103_v53, %v1992_v6 }
 0x346   :  { %v1116_v28 = vpop.permute.xlu0 %1115  ;;  %1300 = vmatprep.subr.bf16.mxu1 %v1078_v48  ;;  %v1062_v49 = vpop.permute.xlu1 %1061 }
 0x347   :  { %v1065_v13 = vsel %vm256_vm3, %v1060_v60, %v1062_v49  ;;  %v1066_v16 = vsel %vm256_vm3, %v1062_v49, %v1064_v50 }
 0x348   :  { %v1076_v14 = vmul.bf16 %v1065_v13, %v1964_v39  ;;  %v1077_v12 = vmul.bf16 %v1066_v16, %v1973_v43  ;;  %v1097_v39 = vsel %vm308_vm4, %v2203_v21, %v1094_v27  ;;  %v1095_v43 = vsel %vm308_vm4, %v2201_v42, %v1090_v23 }
 0x349   :  { %v1105_v6 = vmul.bf16 %v1095_v43, %v1989_v5  ;;  %v1121_v21 = vsel %vm352_vm5, %v2205_v22, %v1116_v28 }
 0x34a   :  { %v1120_v11 = vpop.permute.xlu0 %1119  ;;  %1257 = vmatprep.subr.bf16.mxu0 %v1076_v14  ;;  %1301 = vmatpush1.bf16.msra.mxu1 %v1077_v12  ;;  %v1118_v41 = vpop.permute.xlu1 %1117 }
 0x34b   :  { %1258 = vmatpush1.bf16.msra.mxu0 %v1075_v44  ;;  %1302 = vmatprep.subr.bf16.mxu1 %v2115_v20  ;;  %v1129_v0 = vsel %vm352_vm5, %v1120_v11, %v2205_v22  ;;  %v1122_v20 = vsel %vm352_vm5, %v1116_v28, %v1118_v41  ;;  %v1123_v4 = vsel %vm352_vm5, %v1118_v41, %v1120_v11 }
 0x34c   :  { %1259 = vmatprep.subr.bf16.mxu0 %v2113_v18  ;;  %v1107_v18 = vmul.bf16 %v1097_v39, %v1995_v8  ;;  %v1134_v42 = vmul.bf16 %v1129_v0, %v2016_v30  ;;  %v1133_v5 = vmul.bf16 %v1123_v4, %v2019_v31  ;;  %v1131_v30 = vmul.bf16 %v1121_v21, %v2013_v3 }
 0x34e   :  { %v1142_v60 = vpop.permute.xlu0 %1141  ;;  %1303 = vmatpush1.bf16.msra.mxu1 %v2111_v24  ;;  %v1140_v17 = vpop.permute.xlu1 %1139  ;;  %v1132_v24 = vmul.bf16 %v1122_v20, %v2010_v2 }
 0x34f   :  { %1260 = vmatpush1.bf16.msra.mxu0 %v2109_v9  ;;  %1304 = vmatprep.subr.bf16.mxu1 %v1108_v40  ;;  %v1147_v2 = vsel %vm396_vm6, %v1140_v17, %v1142_v60 }
 0x350   :  { %1261 = vmatprep.subr.bf16.mxu0 %v1106_v1  ;;  %v1157_v31 = vmul.bf16 %v1147_v2, %v2039_v61 }
 0x352   :  { %v1146_v33 = vpop.permute.xlu0 %1145  ;;  %1305 = vmatpush1.bf16.msra.mxu1 %v1107_v18  ;;  %v1144_v37 = vpop.permute.xlu1 %1143 }
 0x353   :  { %v1155_v9 = vsel %vm396_vm6, %v1146_v33, %v1140_v17  ;;  %v1148_v34 = vsel %vm396_vm6, %v1142_v60, %v1144_v37  ;;  %1262 = vmatpush1.bf16.msra.mxu0 %v1105_v6  ;;  %1306 = vmatprep.subr.bf16.mxu1 %v1134_v42  ;;  %v1149_v22 = vsel %vm396_vm6, %v1144_v37, %v1146_v33  ;;  %v1630_v60 = vld [vmem:[%s2305_s5] sm:$0xff]   ;;  %s1691_s5 = smov [#allocation7]  }
 0x354   :  { %v1160_v8 = vmul.bf16 %v1155_v9, %v2042_v62  ;;  %1263 = vmatprep.subr.bf16.mxu0 %v1132_v24  ;;  %v1158_v10 = vmul.bf16 %v1148_v34, %v2036_v59  ;;  %v1159_v52 = vmul.bf16 %v1149_v22, %v2045_v63  ;;  %s1484_s20 = sshll.u32 %s1691_s5, 4  ;;  %s1485_s20 = int_to_ptr.vmem [resolvable:$true] %s1484_s20 }
 0x355   :  { %s1653_s21 = scalar_lea.vmem %s1485_s20, 1024  ;;  %p1658_p9 = scmp.lt.s32.totalorder %s1485_s20, %s1485_s20 }
 0x356   :  { %v1168_v54 = vpop.permute.xlu0 %1167  ;;  %1307 = vmatpush1.bf16.msra.mxu1 %v1133_v5  ;;  %v1166_v50 = vpop.permute.xlu1 %1165  ;;  %p1654_p8 = scmp.ne.s32.totalorder %s1485_s20, %s1653_s21  ;;  %p1659_p10 = scmp.lt.s32.totalorder %s1653_s21, %s1653_s21 }
 0x357   :  { %1264 = vmatpush1.bf16.msra.mxu0 %v1131_v30  ;;  %1308 = vmatprep.subr.bf16.mxu1 %v1160_v8  ;;  %v1173_v62 = vsel %vm440_vm7, %v1166_v50, %v1168_v54 }
 0x358   :  { %1265 = vmatprep.subr.bf16.mxu0 %v1158_v10  ;;  %v1183_v61 = vmul.bf16 %v1173_v62, %v2059_v32  ;;  %p1660_p11 = por %p1659_p10, %p1658_p9 }
 0x35a   :  { %v1172_v57 = vpop.permute.xlu0 %1171  ;;  %1309 = vmatpush1.bf16.msra.mxu1 %v1159_v52  ;;  %v1170_v3 = vpop.permute.xlu1 %1169  ;;  %p1661_p12 = pnand %p1660_p11, %p1654_p8 }
 0x35b   :  { %v1181_v29 = vsel %vm440_vm7, %v1172_v57, %v1166_v50  ;;  %v1174_v45 = vsel %vm440_vm7, %v1168_v54, %v1170_v3  ;;  %v1175_v59 = vsel %vm440_vm7, %v1170_v3, %v1172_v57  ;;  %1266 = vmatpush1.bf16.msra.mxu0 %v1157_v31 }
 0x35c   :  { %v1186_v23 = vmul.bf16 %v1181_v29, %v2062_v36  ;;  %v1184_v25 = vmul.bf16 %v1174_v45, %v2056_v19  ;;  %v1185_v63 = vmul.bf16 %v1175_v59, %v2065_v38 }
 0x35e   :  { %1267 = vmatprep.subr.bf16.mxu0 %v1184_v25  ;;  %1310 = vmatprep.subr.bf16.mxu1 %v1186_v23 }
 0x35f   :  { %1268 = vmatpush1.bf16.msra.mxu0 %v1183_v61  ;;  %1311 = vmatpush1.bf16.msra.mxu1 %v1185_v63 }
 0x362   :  { %1284 = vmatmul.mubr.bf16.vlgmr.msra.gmra.mrb[20].mxu0 %v1627_v55  ;;  %1327 = vmatmul.mubr.bf16.vlgmr.msra.gmra.mrb[20].mxu1 %v1627_v55 }
 0x363   :  { %1401 = vmatprep.mubr.bf16.mxu0 %v1690_v7  ;;  %1444 = vmatprep.mubr.bf16.mxu1 %v1690_v7 }
 0x36b   :  { %v1237_v58 = vpop.permute.xlu0 %1236  ;;  %v1232_v56 = vpop.permute.xlu1 %1231 }
 0x36f   :  { %v777_v17 = vpop.permute.xlu1 %776  ;;  %v782_v20 = vpop.permute.xlu0 %781 }
 0x373   :  { %v1354_v18 = vpop.permute.xlu1 %1353  ;;  %v1359_v6 = vpop.permute.xlu0 %1358 }
 0x374   :  { %v1536_v42 = vadd.f32 %v1354_v18, %v777_v17  ;;  %v1540_v24 = vadd.f32 %v1359_v6, %v782_v20 }
 0x435   :  { %v1285_v36 = vpop.f32.mrb[20].mxu0  ;;  %v1328_v46 = vpop.f32.mrb[20].mxu1 }
 0x436   :  { %v1286_v19 = vadd.f32 %v1285_v36, %v1232_v56  ;;  %v1329_v26 = vadd.f32 %v1328_v46, %v1232_v56  ;;  %v1287_v38 = vpop.f32.mrb[21].mxu0  ;;  %v1330_v27 = vpop.f32.mrb[21].mxu1 }
 0x437   :  { %v1288_v32 = vadd.f32 %v1287_v38, %v1232_v56  ;;  %v1331_v47 = vadd.f32 %v1330_v27, %v1232_v56  ;;  %v1289_v15 = vpop.f32.mrb[22].mxu0  ;;  %v1332_v48 = vpop.f32.mrb[22].mxu1 }
 0x438   :  { %v1290_v51 = vadd.f32 %v1289_v15, %v1237_v58  ;;  %v1333_v28 = vadd.f32 %v1332_v48, %v1237_v58  ;;  %v1291_v49 = vpop.f32.mrb[23].mxu0  ;;  %v1334_v13 = vpop.f32.mrb[23].mxu1  ;;  %v1337_v12 = vmax.f32 %v1286_v19, 0.0  ;;  %v1339_v7 = vmax.f32 %v1329_v26, 0.0 }
 0x439   :  { %v1292_v16 = vadd.f32 %v1291_v49, %v1237_v58  ;;  %v1335_v14 = vadd.f32 %v1334_v13, %v1237_v58  ;;  %v1338_v11 = vmax.f32 %v1288_v32, 0.0  ;;  %v1340_v41 = vmax.f32 %v1331_v47, 0.0 }
 0x43a   :  { %v1341_v44 = vmax.f32 %v1290_v51, 0.0  ;;  %v1343_v53 = vmax.f32 %v1333_v28, 0.0 }
 0x43b   :  { %v1342_v35 = vmax.f32 %v1292_v16, 0.0  ;;  %v1344_v39 = vmax.f32 %v1335_v14, 0.0 }
 0x43c   :  { %v1345_v40 = vpack.c.bf16 %v1341_v44, %v1337_v12  ;;  %v1347_v43 = vpack.c.bf16 %v1343_v53, %v1339_v7 }
 0x43d   :  { %v1346_v1 = vpack.c.bf16 %v1342_v35, %v1338_v11  ;;  %v1348_v0 = vpack.c.bf16 %v1344_v39, %v1340_v41 }
 0x43f   :  { %1369 = vmatprep.subr.bf16.mxu0 %v1346_v1  ;;  %1412 = vmatprep.subr.bf16.mxu1 %v1348_v0 }
 0x440   :  { %1370 = vmatpush1.bf16.msra.mxu0 %v1345_v40  ;;  %1413 = vmatpush1.bf16.msra.mxu1 %v1347_v43 }
 0x443   :  { %1534 = vmatmul.mubr.msk.bf16.vlgmr.msra.gmra.mrb[12].mxu0 %vm156_vm0, %v1630_v60  ;;  %1535 = vmatmul.mubr.msk.bf16.vlgmr.msra.gmra.mrb[12].mxu1 %vm156_vm0, %v1630_v60 }
 0x516   :  { %v1403_v4 = vpop.f32.mrb[12].mxu0  ;;  %v1446_v21 = vpop.f32.mrb[12].mxu1 }
 0x517   :  { %v1537_v33 = vadd.f32 %v1536_v42, %v1403_v4  ;;  %v1553_v37 = vadd.f32 %v1536_v42, %v1446_v21  ;;  %v1405_v9 = vpop.f32.mrb[13].mxu0  ;;  %v1448_v34 = vpop.f32.mrb[13].mxu1 }
 0x518   :  { %v1539_v5 = vadd.f32 %v1536_v42, %v1405_v9  ;;  %v1555_v8 = vadd.f32 %v1536_v42, %v1448_v34  ;;  %v1407_v30 = vpop.f32.mrb[14].mxu0  ;;  %v1450_v22 = vpop.f32.mrb[14].mxu1 }
 0x519   :  { %v1463_v2 = vmax.f32 %v1537_v33, 0.0  ;;  %v1465_v10 = vmax.f32 %v1553_v37, 0.0  ;;  %v1541_v54 = vadd.f32 %v1540_v24, %v1407_v30  ;;  %v1557_v50 = vadd.f32 %v1540_v24, %v1450_v22  ;;  %v1409_v52 = vpop.f32.mrb[15].mxu0  ;;  %v1452_v31 = vpop.f32.mrb[15].mxu1 }
 0x51a   :  { %v1464_v62 = vmax.f32 %v1539_v5, 0.0  ;;  %v1466_v57 = vmax.f32 %v1555_v8, 0.0  ;;  %v1543_v3 = vadd.f32 %v1540_v24, %v1409_v52  ;;  %v1559_v29 = vadd.f32 %v1540_v24, %v1452_v31 }
 0x51b   :  { %1471 = vst [vmem:[#allocation7] sm:$0xff] %v1463_v2  ;;  %1473 = vst [vmem:[#allocation7 + $0x10] sm:$0xff] %v1465_v10  ;;  %v1467_v45 = vmax.f32 %v1541_v54, 0.0  ;;  %v1469_v59 = vmax.f32 %v1557_v50, 0.0 }
 0x51c   :  { %1472 = vst [vmem:[#allocation7 + $0x8] sm:$0xff] %v1464_v62  ;;  %1474 = vst [vmem:[#allocation7 + $0x18] sm:$0xff] %v1466_v57  ;;  %v1468_v23 = vmax.f32 %v1543_v3, 0.0  ;;  %v1470_v25 = vmax.f32 %v1559_v29, 0.0 }
 0x51d   :  { %1475 = vst [vmem:[#allocation7 + $0x20] sm:$0xff] %v1467_v45  ;;  %1477 = vst [vmem:[#allocation7 + $0x30] sm:$0xff] %v1469_v59 }
 0x51e   :  { %1476 = vst [vmem:[#allocation7 + $0x28] sm:$0xff] %v1468_v23  ;;  %1478 = vst [vmem:[#allocation7 + $0x38] sm:$0xff] %v1470_v25 }
 0x51f   :  { %1664 = shalt.err (!%p1661_p12)
}
 0x520   :  { %s1665_s28 = scalar_lea.hbm %s2307_s7, 1024 }
 0x521   :  { %p1666_p13 = scmp.ne.s32.totalorder %s2307_s7, %s1665_s28  ;;  %p1669_p0 = scmp.lt.u32.totalorder %s1665_s28, %s2307_s7 }
 0x523   :  { %p1671_p1 = pnand %p1669_p0, %p1666_p13 }
 0x525   :  { %1674 = shalt.err (!%p1671_p1)
}
 0x526   :  { %s1692_s2 = smov 512   ;;  %s1693_s11 = smov 32  }
 0x527   :  { %1490 = dma.vmem_to_hbm [thread:$0]  %s1485_s20, 1024, %s2307_s7, [#allocation6], %s1692_s2, %s1692_s2, %s1693_s11  }
 0x528   :  { %1677 = dma.done.wait [#allocation6], 1024  }
 0x529   :  { %1678 = vsyncadd [#allocation6], 4294966272 }
 0x52a   :  { %1494 = vsyncpa [#allocation5], 1 }
 0x52b   :  { %1495 = vsyncpa [#allocation6], 1 }

</bundles_post_ra>
